<compile_context>
chip_gen: v7x
topology: tpu7x:2x2x1
jax: 0.10.0
libtpu: 0.0.40
codegen_flags: <defaults>
</compile_context>

<pallas_src>
import jax
import jax.numpy as jnp
import numpy as np
from jax.experimental import pallas as pl
from jax.experimental.pallas import tpu as pltpu


def _round_up(x, m):
    return ((x + m - 1) // m) * m


def _pick_row_tile(sp):
    # Row tile over the output's b-axis: multiple of 16 (bf16 sublane pack),
    # capped at 256 so one (TB, Sa) f32 output block stays modest.
    for tb in (256, 128, 64, 32, 16):
        if sp % tb == 0:
            return tb
    return sp


def _pick_vmem_limit(L, Sp, Sa, Dp, Hp, TB):
    """Compute the real VMEM requirement and clamp to 75% of device VMEM."""
    hs_blk = 2 * (L * Sp * Dp * 2)                           # bf16, double-buffered
    w_blk = Dp * 2 * Hp * 2 + 2 * Hp * 4 + Hp * Hp * 2       # single-buffered weights
    pm_blk = 2 * (TB * 4)
    out_blk = 2 * (TB * Sa * 4)                              # f32, double-buffered
    scratch = Sp * Hp * 2 + Hp * Sa * 2                      # h2 + t^T (bf16)
    interm = Sp * Dp * 4 + Sp * 2 * Hp * 4 + Hp * Sp * 4     # mixed, h, t^T (f32 values)
    need = hs_blk + w_blk + pm_blk + out_blk + scratch + interm
    need = int(need * 1.5) + (4 << 20)                       # Mosaic scratch / spill headroom
    try:
        cap = int(pltpu.get_tpu_info().vmem_capacity_bytes)
    except Exception:
        cap = 128 << 20
    return max(32 << 20, min(need, (cap * 3) // 4))


def _weight_spec(shape, index_map, single_buffer):
    """BlockSpec for a grid-invariant weight block; single-buffer to save VMEM."""
    if single_buffer:
        return pl.BlockSpec(shape, index_map, pipeline_mode=pl.Buffered(1))
    return pl.BlockSpec(shape, index_map)


# --------------------------------------------------------------------------
# Pallas kernel: grid = (batch, output-row-tile)
# --------------------------------------------------------------------------
def _bilinear_aligner_kernel(
    mixw_ref,    # SMEM (L,) f32            scalar-mix weights (gamma * softmax(s))
    hs_ref,      # VMEM (1, L, Sp, Dp) bf16 stacked decoder hidden states (padded)
    wcat_ref,    # VMEM (Dp, 2*Hp) bf16     [w_src | w_tgt] pre-transposed, padded
    bcat_ref,    # VMEM (1, 2*Hp) f32       [b_src | b_tgt]
    wbilT_ref,   # VMEM (Hp, Hp) bf16       transposed bilinear weight W^T[y, x]
    pmask_ref,   # VMEM (1, TB, 1) f32      pointer_mask rows for this tile
    out_ref,     # VMEM (1, TB, Sa) f32     aligned[q, b, a] row tile
    h2_s,        # VMEM scratch (Sp, Hp) bf16   tgt projection, per batch
    tT_s,        # VMEM scratch (Hp, Sa) bf16   (h1 @ W_bil)^T, per batch
):
    f32, bf16 = jnp.float32, jnp.bfloat16
    L = hs_ref.shape[1]
    Sp, Hp = h2_s.shape
    Sa = tT_s.shape[1]
    TB = out_ref.shape[1]
    j = pl.program_id(1)

    # ---- per-batch preamble (invariant along the row-tile axis) ----
    @pl.when(j == 0)
    def _():
        # ScalarMix over the last L decoder layers (f32 accumulation).
        mixed = mixw_ref[0] * hs_ref[0, 0].astype(f32)
        for l in range(1, L):
            mixed = mixed + mixw_ref[l] * hs_ref[0, l].astype(f32)
        # TODO(synk): on bf16-VALU chips (v6e/v7x) the mix/bias/LeakyReLU could
        # run in bf16; kept in f32 for v5e portability and accuracy.

        # Fused src/tgt projection: one bf16 MXU matmul, f32 accumulate.
        h = jnp.dot(mixed.astype(bf16), wcat_ref[...], preferred_element_type=f32)
        h = h + bcat_ref[...]
        h = jnp.maximum(h, f32(0.01) * h)            # LeakyReLU(0.01)
        h_bf = h.astype(bf16)
        h2_s[...] = h_bf[:, Hp:]                     # tgt projection, reused per tile

        # tT[y, a] = sum_x W[x, y] * h1[a, x]  — the only transposed-operand
        # contraction, done ONCE per batch so the hot per-tile matmul is plain.
        tT = jax.lax.dot_general(
            wbilT_ref[...], h_bf[:, :Hp],
            (((1,), (1,)), ((), ())), preferred_element_type=f32)   # (Hp, Sp)
        if Sa > Sp:                                  # static: zero lane padding
            tT_s[...] = jnp.zeros_like(tT_s)
        tT_s[:, 0:Sp] = tT.astype(bf16)

    # ---- per-row-tile bilinear + masking epilogue ----
    row0 = pl.multiple_of(j * TB, TB)
    h2_tile = h2_s[pl.ds(row0, TB), :]                                  # (TB, Hp)
    aligned = jnp.dot(h2_tile, tT_s[...], preferred_element_type=f32)   # (TB, Sa)

    # tril(-1): keep a <= b-1; masked rows -> -inf; column 0 of masked rows -> 0
    b_idx = jax.lax.broadcasted_iota(jnp.int32, (TB, Sa), 0) + j * TB
    a_idx = jax.lax.broadcasted_iota(jnp.int32, (TB, Sa), 1)
    pm = pmask_ref[0] > f32(0.0)                                        # (TB, 1)
    cond_zero = pm & (a_idx == 0)
    cond_inf = pm | (a_idx >= b_idx)
    out_ref[0] = jnp.where(cond_zero, f32(0.0),
                           jnp.where(cond_inf, f32(-jnp.inf), aligned))


# --------------------------------------------------------------------------
# One-time parameter packing (hoisted out of the per-call forward)
# --------------------------------------------------------------------------
def prepare_aligner_params(mix_weights, w_src, b_src, w_tgt, b_tgt, w_bil):
    D, H = w_src.shape
    Dp = _round_up(D, 128)
    Hp = _round_up(H, 128)

    w_cat = jnp.zeros((Dp, 2 * Hp), jnp.float32)
    w_cat = w_cat.at[:D, :H].set(w_src).at[:D, Hp:Hp + H].set(w_tgt)

    b_cat = jnp.zeros((1, 2 * Hp), jnp.float32)
    b_cat = b_cat.at[:, :H].set(jnp.reshape(b_src, (1, H)))
    b_cat = b_cat.at[:, Hp:Hp + H].set(jnp.reshape(b_tgt, (1, H)))

    # Pre-transposed bilinear weight (so the kernel never transposes a weight).
    w_bil_t = jnp.pad(w_bil, ((0, Hp - H), (0, Hp - H))).T

    return {
        "mix_weights": jnp.asarray(mix_weights, jnp.float32),
        "w_cat": w_cat.astype(jnp.bfloat16),
        "b_cat": b_cat,
        "w_bil_t": w_bil_t.astype(jnp.bfloat16),
    }


# --------------------------------------------------------------------------
# Forward wrapper
# --------------------------------------------------------------------------
def bilinear_aligner_forward(hidden_states, pointer_mask, params,
                             single_buffer_weights=True):
    """hidden_states: (B, L, S, D) f32, pointer_mask: (B, S) bool -> (B, S, S) f32."""
    B, L, S, D = hidden_states.shape
    w_cat, b_cat = params["w_cat"], params["b_cat"]
    w_bil_t, mix_weights = params["w_bil_t"], params["mix_weights"]
    Dp = w_cat.shape[0]
    Hp = w_bil_t.shape[0]

    Sp = _round_up(S, 16)     # sublane-side padding (hs seq axis, output b-axis)
    Sa = _round_up(S, 128)    # lane-side padding (output a-axis: lane-dense stores)
    TB = _pick_row_tile(Sp)
    n_row_tiles = Sp // TB

    hs = hidden_states
    if Sp != S or Dp != D:
        hs = jnp.pad(hs, ((0, 0), (0, 0), (0, Sp - S), (0, Dp - D)))
    hs = hs.astype(jnp.bfloat16)

    pm = pointer_mask.astype(jnp.float32)
    if Sp != S:
        pm = jnp.pad(pm, ((0, 0), (0, Sp - S)))
    pm = pm[:, :, None]

    flops = B * (2 * L * Sp * Dp                 # scalar mix
                 + 2 * Sp * Dp * (2 * Hp)        # fused src/tgt projection
                 + 2 * Sp * Hp * Hp              # W^T (.) h1
                 + 2 * Sp * Sa * Hp)             # per-tile bilinear matmuls
    bytes_accessed = (hs.size * 2 + w_cat.size * 2 + w_bil_t.size * 2
                      + b_cat.size * 4 + pm.size * 4 + B * Sp * Sa * 4)
    cost = pl.CostEstimate(flops=flops, transcendentals=0,
                           bytes_accessed=bytes_accessed)

    out = pl.pallas_call(
        _bilinear_aligner_kernel,
        out_shape=jax.ShapeDtypeStruct((B, Sp, Sa), jnp.float32),
        grid=(B, n_row_tiles),
        in_specs=[
            pl.BlockSpec(memory_space=pltpu.MemorySpace.SMEM),           # mix weights
            pl.BlockSpec((1, L, Sp, Dp), lambda b, j: (b, 0, 0, 0)),     # hidden states
            _weight_spec((Dp, 2 * Hp), lambda b, j: (0, 0),
                         single_buffer_weights),                         # [w_src|w_tgt]
            _weight_spec((1, 2 * Hp), lambda b, j: (0, 0),
                         single_buffer_weights),                         # [b_src|b_tgt]
            _weight_spec((Hp, Hp), lambda b, j: (0, 0),
                         single_buffer_weights),                         # w_bil^T
            pl.BlockSpec((1, TB, 1), lambda b, j: (b, j, 0)),            # pointer mask
        ],
        out_specs=pl.BlockSpec((1, TB, Sa), lambda b, j: (b, j, 0)),
        scratch_shapes=[
            pltpu.VMEM((Sp, Hp), jnp.bfloat16),   # h2 (tgt projection), per batch
            pltpu.VMEM((Hp, Sa), jnp.bfloat16),   # (h1 @ W_bil)^T, per batch
        ],
        compiler_params=pltpu.CompilerParams(
            # Batch is parallel (maps to both v7x TensorCores at B>=2); the
            # row-tile axis carries the per-batch scratch -> arbitrary.
            dimension_semantics=("parallel", "arbitrary"),
            vmem_limit_bytes=_pick_vmem_limit(L, Sp, Sa, Dp, Hp, TB),
        ),
        cost_estimate=cost,
    )(mix_weights, hs, w_cat, b_cat, w_bil_t, pm)

    return out[:, :S, :S]


# --------------------------------------------------------------------------
# Glue reproducing Text2GraphPoint2TgtPAware.forward's mask / pointer_ids prep
# --------------------------------------------------------------------------
def make_pointer_inputs(decoder_input_ids, tgt_pt_pointer):
    pointer_ids = jnp.full_like(tgt_pt_pointer, -100)
    pointer_ids = pointer_ids.at[:, 1:].set(tgt_pt_pointer[:, :-1])

    ids = decoder_input_ids
    S = ids.shape[1]
    eq = ids[:, :, None] == ids[:, None, :]
    tril = jnp.tril(jnp.ones((S, S), dtype=bool), -1)
    m = jnp.any(eq & tril[None], axis=2)
    m = jnp.roll(m, shift=-1, axis=1)
    pointer_mask = ~m
    return pointer_ids, pointer_mask


# --------------------------------------------------------------------------
# Pure-JAX f32 reference of BilinearAligner.forward (training path)
# --------------------------------------------------------------------------
def reference_aligner(hidden_states, mix_weights, w_src, b_src, w_tgt, b_tgt,
                      w_bil, pointer_mask):
    mixed = jnp.einsum('l,blsd->bsd', mix_weights, hidden_states)
    h1 = jax.nn.leaky_relu(mixed @ w_src + b_src, 0.01)
    h2 = jax.nn.leaky_relu(mixed @ w_tgt + b_tgt, 0.01)
    aligned = jnp.einsum('qax,xy,qby->qba', h1, w_bil, h2)
    S = aligned.shape[-1]
    tril = jnp.tril(jnp.ones((S, S), dtype=bool), -1)
    aligned = jnp.where(tril[None], aligned, -jnp.inf)
    aligned = jnp.where(pointer_mask[:, :, None], -jnp.inf, aligned)
    col0 = jnp.where(pointer_mask, 0.0, aligned[:, :, 0])
    aligned = aligned.at[:, :, 0].set(col0)
    return aligned


if __name__ == "__main__":
    # Small, module-consistent shapes (the wrapper pads asymmetrically:
    # seq->16-multiple on sublane axes, d_model/hidden/output-lane->128).
    B, L, S, D, H = 2, 3, 16, 32, 32   # batch, bart_layers, seq, d_model, hidden_size

    key = jax.random.PRNGKey(0)
    k_ids, k_ptr, k_hs, k_ws, k_bs, k_wt, k_bt, k_bil = jax.random.split(key, 8)

    decoder_input_ids = jax.random.randint(k_ids, (B, S), 0, 8, dtype=jnp.int32)
    tgt_pt_pointer = jax.random.randint(k_ptr, (B, S), 0, S, dtype=jnp.int32)
    hidden_states = jax.random.normal(k_hs, (B, L, S, D), dtype=jnp.float32)

    # ScalarMix: scalar params init to 0 -> softmax uniform; gamma init 1.0.
    mix_weights = (1.0 * jax.nn.softmax(jnp.zeros((L,), jnp.float32))).astype(jnp.float32)
    w_src = jax.random.normal(k_ws, (D, H), jnp.float32) * 0.05
    b_src = jax.random.normal(k_bs, (1, H), jnp.float32) * 0.05
    w_tgt = jax.random.normal(k_wt, (D, H), jnp.float32) * 0.05
    b_tgt = jax.random.normal(k_bt, (1, H), jnp.float32) * 0.05
    # PyTorch inits bilinear_weight to zeros; use small values to exercise the MXU.
    w_bil = jax.random.normal(k_bil, (H, H), jnp.float32) * 0.05

    pointer_ids, pointer_mask = make_pointer_inputs(decoder_input_ids, tgt_pt_pointer)

    # One-time parameter packing (padding / concat / bf16 casts) — not per step.
    params = prepare_aligner_params(mix_weights, w_src, b_src, w_tgt, b_tgt, w_bil)

    run = jax.jit(bilinear_aligner_forward, static_argnames=("single_buffer_weights",))
    try:
        aligned = jax.block_until_ready(
            run(hidden_states, pointer_mask, params, single_buffer_weights=True))
    except Exception:
        # Fallback if this JAX build rejects pipeline_mode=pl.Buffered(1).
        aligned = jax.block_until_ready(
            run(hidden_states, pointer_mask, params, single_buffer_weights=False))

    ref = reference_aligner(hidden_states, mix_weights, w_src, b_src, w_tgt, b_tgt,
                            w_bil, pointer_mask)
    ref = jax.block_until_ready(ref)

    assert aligned.shape == (B, S, S)
    # bf16 inputs with f32 accumulation: compare against the f32 reference with
    # a tolerance that comfortably covers bf16 rounding.
    np.testing.assert_allclose(np.asarray(aligned), np.asarray(ref),
                               rtol=2e-2, atol=2e-2)
    print("KERNEL_OK")
</pallas_src>

<mosaic_0001>
module attributes {stable_mosaic.version = 11 : i64} {
  func.func @_bilinear_aligner_kernel(%arg0: i32, %arg1: i32, %arg2: memref<3xf32, #tpu.memory_space<smem>>, %arg3: memref<1x3x16x128xbf16, #tpu.memory_space<vmem>>, %arg4: memref<128x256xbf16, #tpu.memory_space<vmem>>, %arg5: memref<1x256xf32, #tpu.memory_space<vmem>>, %arg6: memref<128x128xbf16, #tpu.memory_space<vmem>>, %arg7: memref<1x16x1xf32, #tpu.memory_space<vmem>>, %arg8: memref<1x16x128xf32, #tpu.memory_space<vmem>>, %arg9: memref<16x128xbf16, #tpu.memory_space<vmem>>, %arg10: memref<128x128xbf16, #tpu.memory_space<vmem>>) attributes {dimension_semantics = [#tpu.dimension_semantics<parallel>, #tpu.dimension_semantics<arbitrary>], iteration_bounds = array<i64: 2, 1>, scalar_prefetch = 0 : i64, scratch_operands = 2 : i64, tpu.core_type = #tpu.core_type<tc>, window_params = [{transform_indices = @transform_0, window_bounds = array<i64: 3>}, {transform_indices = @transform_1, window_bounds = array<i64: 1, 3, 16, 128>}, {pipeline_mode = #tpu.pipeline_mode<synchronous>, transform_indices = @transform_2, window_bounds = array<i64: 128, 256>}, {pipeline_mode = #tpu.pipeline_mode<synchronous>, transform_indices = @transform_3, window_bounds = array<i64: 1, 256>}, {pipeline_mode = #tpu.pipeline_mode<synchronous>, transform_indices = @transform_4, window_bounds = array<i64: 128, 128>}, {transform_indices = @transform_5, window_bounds = array<i64: 1, 16, 1>}, {transform_indices = @transform_6, window_bounds = array<i64: 1, 16, 128>}]} {
    %c0_i32 = arith.constant 0 : i32
    %0 = arith.cmpi eq, %arg1, %c0_i32 : i32
    %1 = arith.extui %0 : i1 to i32
    %c0_i32_0 = arith.constant 0 : i32
    %2 = arith.cmpi ne, %1, %c0_i32_0 : i32
    scf.if %2 {
      %c0_14 = arith.constant 0 : index
      %32 = memref.load %arg2[%c0_14] : memref<3xf32, #tpu.memory_space<smem>>
      %c0_15 = arith.constant 0 : index
      %c0_16 = arith.constant 0 : index
      %c0_17 = arith.constant 0 : index
      %c0_18 = arith.constant 0 : index
      %33 = vector.load %arg3[%c0_15, %c0_16, %c0_17, %c0_18] : memref<1x3x16x128xbf16, #tpu.memory_space<vmem>>, vector<1x1x16x128xbf16>
      %34 = vector.shape_cast %33 : vector<1x1x16x128xbf16> to vector<16x128xbf16>
      %35 = arith.extf %34 : vector<16x128xbf16> to vector<16x128xf32>
      %36 = vector.broadcast %32 : f32 to vector<16x128xf32>
      %37 = arith.mulf %36, %35 : vector<16x128xf32>
      %c1 = arith.constant 1 : index
      %38 = memref.load %arg2[%c1] : memref<3xf32, #tpu.memory_space<smem>>
      %c0_19 = arith.constant 0 : index
      %c1_20 = arith.constant 1 : index
      %c0_21 = arith.constant 0 : index
      %c0_22 = arith.constant 0 : index
      %39 = vector.load %arg3[%c0_19, %c1_20, %c0_21, %c0_22] : memref<1x3x16x128xbf16, #tpu.memory_space<vmem>>, vector<1x1x16x128xbf16>
      %40 = vector.shape_cast %39 : vector<1x1x16x128xbf16> to vector<16x128xbf16>
      %41 = arith.extf %40 : vector<16x128xbf16> to vector<16x128xf32>
      %42 = vector.broadcast %38 : f32 to vector<16x128xf32>
      %43 = arith.mulf %42, %41 : vector<16x128xf32>
      %44 = arith.addf %37, %43 : vector<16x128xf32>
      %c2 = arith.constant 2 : index
      %45 = memref.load %arg2[%c2] : memref<3xf32, #tpu.memory_space<smem>>
      %c0_23 = arith.constant 0 : index
      %c2_24 = arith.constant 2 : index
      %c0_25 = arith.constant 0 : index
      %c0_26 = arith.constant 0 : index
      %46 = vector.load %arg3[%c0_23, %c2_24, %c0_25, %c0_26] : memref<1x3x16x128xbf16, #tpu.memory_space<vmem>>, vector<1x1x16x128xbf16>
      %47 = vector.shape_cast %46 : vector<1x1x16x128xbf16> to vector<16x128xbf16>
      %48 = arith.extf %47 : vector<16x128xbf16> to vector<16x128xf32>
      %49 = vector.broadcast %45 : f32 to vector<16x128xf32>
      %50 = arith.mulf %49, %48 : vector<16x128xf32>
      %51 = arith.addf %44, %50 : vector<16x128xf32>
      %52 = arith.truncf %51 : vector<16x128xf32> to vector<16x128xbf16>
      %c0_27 = arith.constant 0 : index
      %c0_28 = arith.constant 0 : index
      %53 = vector.load %arg4[%c0_27, %c0_28] : memref<128x256xbf16, #tpu.memory_space<vmem>>, vector<128x256xbf16>
      %cst_29 = arith.constant dense<0.000000e+00> : vector<16x256xf32>
      %54 = tpu.matmul %52, %53, %cst_29 {dimension_numbers = #tpu.dot_dimension_numbers<[1], [0], [0], [1], [0, 0, 1, 1], [], []>} : vector<16x128xbf16>, vector<128x256xbf16>, vector<16x256xf32> -> vector<16x256xf32>
      %c0_30 = arith.constant 0 : index
      %c0_31 = arith.constant 0 : index
      %55 = vector.load %arg5[%c0_30, %c0_31] : memref<1x256xf32, #tpu.memory_space<vmem>>, vector<1x256xf32>
      %56 = vector.broadcast %55 : vector<1x256xf32> to vector<16x256xf32>
      %57 = arith.addf %54, %56 : vector<16x256xf32>
      %cst_32 = arith.constant 0.00999999977 : f32
      %58 = vector.broadcast %cst_32 : f32 to vector<16x256xf32>
      %59 = arith.mulf %58, %57 : vector<16x256xf32>
      %60 = arith.maximumf %57, %59 : vector<16x256xf32>
      %61 = arith.truncf %60 : vector<16x256xf32> to vector<16x256xbf16>
      %62 = vector.extract_strided_slice %61 {offsets = [0, 128], sizes = [16, 128], strides = [1, 1]} : vector<16x256xbf16> to vector<16x128xbf16>
      %c0_33 = arith.constant 0 : index
      %c0_34 = arith.constant 0 : index
      %63 = vector.load %arg9[%c0_33, %c0_34] : memref<16x128xbf16, #tpu.memory_space<vmem>>, vector<16x128xbf16>
      tpu.vector_store %arg9[%c0_33, %c0_34], %62 {strides = array<i32>} : memref<16x128xbf16, #tpu.memory_space<vmem>>, vector<16x128xbf16>,
      %c0_35 = arith.constant 0 : index
      %c0_36 = arith.constant 0 : index
      %64 = vector.load %arg6[%c0_35, %c0_36] : memref<128x128xbf16, #tpu.memory_space<vmem>>, vector<128x128xbf16>
      %65 = vector.extract_strided_slice %61 {offsets = [0, 0], sizes = [16, 128], strides = [1, 1]} : vector<16x256xbf16> to vector<16x128xbf16>
      %cst_37 = arith.constant dense<0.000000e+00> : vector<128x16xf32>
      %66 = tpu.matmul %64, %65, %cst_37 {dimension_numbers = #tpu.dot_dimension_numbers<[1], [1], [0], [0], [0, 0, 1, 0], [], []>} : vector<128x128xbf16>, vector<16x128xbf16>, vector<128x16xf32> -> vector<128x16xf32>
      %cst_38 = arith.constant 0.000000e+00 : bf16
      %67 = vector.broadcast %cst_38 : bf16 to vector<128x128xbf16>
      %c0_39 = arith.constant 0 : index
      %c0_40 = arith.constant 0 : index
      %68 = vector.load %arg10[%c0_39, %c0_40] : memref<128x128xbf16, #tpu.memory_space<vmem>>, vector<128x128xbf16>
      tpu.vector_store %arg10[%c0_39, %c0_40], %67 {strides = array<i32>} : memref<128x128xbf16, #tpu.memory_space<vmem>>, vector<128x128xbf16>,
      %69 = arith.truncf %66 : vector<128x16xf32> to vector<128x16xbf16>
      %c0_41 = arith.constant 0 : index
      %c0_42 = arith.constant 0 : index
      %70 = vector.load %arg10[%c0_41, %c0_42] : memref<128x128xbf16, #tpu.memory_space<vmem>>, vector<128x16xbf16>
      tpu.vector_store %arg10[%c0_41, %c0_42], %69 {strides = array<i32>} : memref<128x128xbf16, #tpu.memory_space<vmem>>, vector<128x16xbf16>,
    } else {
    }
    %c16_i32 = arith.constant 16 : i32
    %3 = arith.muli %arg1, %c16_i32 : i32
    %4 = tpu.assume_multiple %3, 16 : i32
    %5 = arith.index_cast %4 : i32 to index
    %c0 = arith.constant 0 : index
    %6 = vector.load %arg9[%5, %c0] : memref<16x128xbf16, #tpu.memory_space<vmem>>, vector<16x128xbf16>
    %c0_1 = arith.constant 0 : index
    %c0_2 = arith.constant 0 : index
    %7 = vector.load %arg10[%c0_1, %c0_2] : memref<128x128xbf16, #tpu.memory_space<vmem>>, vector<128x128xbf16>
    %cst = arith.constant dense<0.000000e+00> : vector<16x128xf32>
    %8 = tpu.matmul %6, %7, %cst {dimension_numbers = #tpu.dot_dimension_numbers<[1], [0], [0], [1], [0, 0, 1, 1], [], []>} : vector<16x128xbf16>, vector<128x128xbf16>, vector<16x128xf32> -> vector<16x128xf32>
    %9 = tpu.iota {dimensions = array<i32: 0>} : vector<16x128xi32>
    %c16_i32_3 = arith.constant 16 : i32
    %10 = arith.muli %arg1, %c16_i32_3 : i32
    %11 = vector.broadcast %10 : i32 to vector<16x128xi32>
    %12 = arith.addi %9, %11 : vector<16x128xi32>
    %13 = tpu.iota {dimensions = array<i32: 1>} : vector<16x128xi32>
    %c0_4 = arith.constant 0 : index
    %c0_5 = arith.constant 0 : index
    %c0_6 = arith.constant 0 : index
    %14 = vector.load %arg7[%c0_4, %c0_5, %c0_6] : memref<1x16x1xf32, #tpu.memory_space<vmem>>, vector<1x16x1xf32>
    %15 = vector.shape_cast %14 : vector<1x16x1xf32> to vector<16x1xf32>
    %cst_7 = arith.constant 0.000000e+00 : f32
    %16 = vector.broadcast %cst_7 : f32 to vector<16x1xf32>
    %17 = arith.cmpf ogt, %15, %16 : vector<16x1xf32>
    %c0_i32_8 = arith.constant 0 : i32
    %18 = vector.broadcast %c0_i32_8 : i32 to vector<16x128xi32>
    %19 = arith.cmpi eq, %13, %18 : vector<16x128xi32>
    %20 = vector.broadcast %17 : vector<16x1xi1> to vector<16x128xi1>
    %21 = arith.andi %20, %19 : vector<16x128xi1>
    %22 = arith.cmpi sge, %13, %12 : vector<16x128xi32>
    %23 = vector.broadcast %17 : vector<16x1xi1> to vector<16x128xi1>
    %24 = arith.ori %23, %22 : vector<16x128xi1>
    %cst_9 = arith.constant 0xFF800000 : f32
    %25 = vector.broadcast %cst_9 : f32 to vector<16x128xf32>
    %26 = arith.select %24, %25, %8 : vector<16x128xi1>, vector<16x128xf32>
    %cst_10 = arith.constant 0.000000e+00 : f32
    %27 = vector.broadcast %cst_10 : f32 to vector<16x128xf32>
    %28 = arith.select %21, %27, %26 : vector<16x128xi1>, vector<16x128xf32>
    %c0_11 = arith.constant 0 : index
    %c0_12 = arith.constant 0 : index
    %c0_13 = arith.constant 0 : index
    %29 = vector.load %arg8[%c0_11, %c0_12, %c0_13] : memref<1x16x128xf32, #tpu.memory_space<vmem>>, vector<1x16x128xf32>
    %30 = vector.shape_cast %29 : vector<1x16x128xf32> to vector<16x128xf32>
    %31 = vector.shape_cast %28 : vector<16x128xf32> to vector<1x16x128xf32>
    tpu.vector_store %arg8[%c0_11, %c0_12, %c0_13], %31 {strides = array<i32>} : memref<1x16x128xf32, #tpu.memory_space<vmem>>, vector<1x16x128xf32>,
    return
  }
  func.func @transform_0(%arg0: i32, %arg1: i32) -> i32 {
    %c0_i32 = arith.constant 0 : i32
    %c0_i32_0 = arith.constant 0 : i32
    return %c0_i32 : i32
  }
  func.func @transform_1(%arg0: i32, %arg1: i32) -> (i32, i32, i32, i32) {
    %c0_i32 = arith.constant 0 : i32
    %c0_i32_0 = arith.constant 0 : i32
    %c0_i32_1 = arith.constant 0 : i32
    %c0_i32_2 = arith.constant 0 : i32
    return %arg0, %c0_i32, %c0_i32_0, %c0_i32_1 : i32, i32, i32, i32
  }
  func.func @transform_2(%arg0: i32, %arg1: i32) -> (i32, i32) {
    %c0_i32 = arith.constant 0 : i32
    %c0_i32_0 = arith.constant 0 : i32
    %c0_i32_1 = arith.constant 0 : i32
    return %c0_i32, %c0_i32_0 : i32, i32
  }
  func.func @transform_3(%arg0: i32, %arg1: i32) -> (i32, i32) {
    %c0_i32 = arith.constant 0 : i32
    %c0_i32_0 = arith.constant 0 : i32
    %c0_i32_1 = arith.constant 0 : i32
    return %c0_i32, %c0_i32_0 : i32, i32
  }
  func.func @transform_4(%arg0: i32, %arg1: i32) -> (i32, i32) {
    %c0_i32 = arith.constant 0 : i32
    %c0_i32_0 = arith.constant 0 : i32
    %c0_i32_1 = arith.constant 0 : i32
    return %c0_i32, %c0_i32_0 : i32, i32
  }
  func.func @transform_5(%arg0: i32, %arg1: i32) -> (i32, i32, i32) {
    %c0_i32 = arith.constant 0 : i32
    %c0_i32_0 = arith.constant 0 : i32
    return %arg0, %arg1, %c0_i32 : i32, i32, i32
  }
  func.func @transform_6(%arg0: i32, %arg1: i32) -> (i32, i32, i32) {
    %c0_i32 = arith.constant 0 : i32
    %c0_i32_0 = arith.constant 0 : i32
    return %arg0, %arg1, %c0_i32 : i32, i32, i32
  }
}

module attributes {stable_mosaic.version = 11 : i64} {
  func.func @_bilinear_aligner_kernel(%arg0: i32, %arg1: i32, %arg2: memref<3xf32, #tpu.memory_space<smem>>, %arg3: memref<1x3x16x128xbf16, #tpu.memory_space<vmem>>, %arg4: memref<128x256xbf16, #tpu.memory_space<vmem>>, %arg5: memref<1x256xf32, #tpu.memory_space<vmem>>, %arg6: memref<128x128xbf16, #tpu.memory_space<vmem>>, %arg7: memref<1x16x1xf32, #tpu.memory_space<vmem>>, %arg8: memref<1x16x128xf32, #tpu.memory_space<vmem>>, %arg9: memref<16x128xbf16, #tpu.memory_space<vmem>>, %arg10: memref<128x128xbf16, #tpu.memory_space<vmem>>) attributes {dimension_semantics = [#tpu.dimension_semantics<parallel>, #tpu.dimension_semantics<arbitrary>], iteration_bounds = array<i64: 2, 1>, scalar_prefetch = 0 : i64, scratch_operands = 2 : i64, tpu.core_type = #tpu.core_type<tc>, window_params = [{transform_indices = @transform_0, window_bounds = array<i64: 3>}, {transform_indices = @transform_1, window_bounds = array<i64: 1, 3, 16, 128>}, {pipeline_mode = #tpu.pipeline_mode<synchronous>, transform_indices = @transform_2, window_bounds = array<i64: 128, 256>}, {pipeline_mode = #tpu.pipeline_mode<synchronous>, transform_indices = @transform_3, window_bounds = array<i64: 1, 256>}, {pipeline_mode = #tpu.pipeline_mode<synchronous>, transform_indices = @transform_4, window_bounds = array<i64: 128, 128>}, {transform_indices = @transform_5, window_bounds = array<i64: 1, 16, 1>}, {transform_indices = @transform_6, window_bounds = array<i64: 1, 16, 128>}]} {
    %c0_i32 = arith.constant 0 : i32
    %0 = arith.cmpi eq, %arg1, %c0_i32 : i32
    %1 = arith.extui %0 : i1 to i32
    %c0_i32_0 = arith.constant 0 : i32
    %2 = arith.cmpi ne, %1, %c0_i32_0 : i32
    scf.if %2 {
      %c0_14 = arith.constant 0 : index
      %32 = memref.load %arg2[%c0_14] : memref<3xf32, #tpu.memory_space<smem>>
      %c0_15 = arith.constant 0 : index
      %c0_16 = arith.constant 0 : index
      %c0_17 = arith.constant 0 : index
      %c0_18 = arith.constant 0 : index
      %33 = vector.load %arg3[%c0_15, %c0_16, %c0_17, %c0_18] : memref<1x3x16x128xbf16, #tpu.memory_space<vmem>>, vector<1x1x16x128xbf16>
      %34 = vector.shape_cast %33 : vector<1x1x16x128xbf16> to vector<16x128xbf16>
      %35 = arith.extf %34 : vector<16x128xbf16> to vector<16x128xf32>
      %36 = vector.broadcast %32 : f32 to vector<16x128xf32>
      %37 = arith.mulf %36, %35 : vector<16x128xf32>
      %c1 = arith.constant 1 : index
      %38 = memref.load %arg2[%c1] : memref<3xf32, #tpu.memory_space<smem>>
      %c0_19 = arith.constant 0 : index
      %c1_20 = arith.constant 1 : index
      %c0_21 = arith.constant 0 : index
      %c0_22 = arith.constant 0 : index
      %39 = vector.load %arg3[%c0_19, %c1_20, %c0_21, %c0_22] : memref<1x3x16x128xbf16, #tpu.memory_space<vmem>>, vector<1x1x16x128xbf16>
      %40 = vector.shape_cast %39 : vector<1x1x16x128xbf16> to vector<16x128xbf16>
      %41 = arith.extf %40 : vector<16x128xbf16> to vector<16x128xf32>
      %42 = vector.broadcast %38 : f32 to vector<16x128xf32>
      %43 = arith.mulf %42, %41 : vector<16x128xf32>
      %44 = arith.addf %37, %43 : vector<16x128xf32>
      %c2 = arith.constant 2 : index
      %45 = memref.load %arg2[%c2] : memref<3xf32, #tpu.memory_space<smem>>
      %c0_23 = arith.constant 0 : index
      %c2_24 = arith.constant 2 : index
      %c0_25 = arith.constant 0 : index
      %c0_26 = arith.constant 0 : index
      %46 = vector.load %arg3[%c0_23, %c2_24, %c0_25, %c0_26] : memref<1x3x16x128xbf16, #tpu.memory_space<vmem>>, vector<1x1x16x128xbf16>
      %47 = vector.shape_cast %46 : vector<1x1x16x128xbf16> to vector<16x128xbf16>
      %48 = arith.extf %47 : vector<16x128xbf16> to vector<16x128xf32>
      %49 = vector.broadcast %45 : f32 to vector<16x128xf32>
      %50 = arith.mulf %49, %48 : vector<16x128xf32>
      %51 = arith.addf %44, %50 : vector<16x128xf32>
      %52 = arith.truncf %51 : vector<16x128xf32> to vector<16x128xbf16>
      %c0_27 = arith.constant 0 : index
      %c0_28 = arith.constant 0 : index
      %53 = vector.load %arg4[%c0_27, %c0_28] : memref<128x256xbf16, #tpu.memory_space<vmem>>, vector<128x256xbf16>
      %cst_29 = arith.constant dense<0.000000e+00> : vector<16x256xf32>
      %54 = tpu.matmul %52, %53, %cst_29 {dimension_numbers = #tpu.dot_dimension_numbers<[1], [0], [0], [1], [0, 0, 1, 1], [], []>} : vector<16x128xbf16>, vector<128x256xbf16>, vector<16x256xf32> -> vector<16x256xf32>
      %c0_30 = arith.constant 0 : index
      %c0_31 = arith.constant 0 : index
      %55 = vector.load %arg5[%c0_30, %c0_31] : memref<1x256xf32, #tpu.memory_space<vmem>>, vector<1x256xf32>
      %56 = vector.broadcast %55 : vector<1x256xf32> to vector<16x256xf32>
      %57 = arith.addf %54, %56 : vector<16x256xf32>
      %cst_32 = arith.constant 0.00999999977 : f32
      %58 = vector.broadcast %cst_32 : f32 to vector<16x256xf32>
      %59 = arith.mulf %58, %57 : vector<16x256xf32>
      %60 = arith.maximumf %57, %59 : vector<16x256xf32>
      %61 = arith.truncf %60 : vector<16x256xf32> to vector<16x256xbf16>
      %62 = vector.extract_strided_slice %61 {offsets = [0, 128], sizes = [16, 128], strides = [1, 1]} : vector<16x256xbf16> to vector<16x128xbf16>
      %c0_33 = arith.constant 0 : index
      %c0_34 = arith.constant 0 : index
      %63 = vector.load %arg9[%c0_33, %c0_34] : memref<16x128xbf16, #tpu.memory_space<vmem>>, vector<16x128xbf16>
      tpu.vector_store %arg9[%c0_33, %c0_34], %62 {strides = array<i32>} : memref<16x128xbf16, #tpu.memory_space<vmem>>, vector<16x128xbf16>,
      %c0_35 = arith.constant 0 : index
      %c0_36 = arith.constant 0 : index
      %64 = vector.load %arg6[%c0_35, %c0_36] : memref<128x128xbf16, #tpu.memory_space<vmem>>, vector<128x128xbf16>
      %65 = vector.extract_strided_slice %61 {offsets = [0, 0], sizes = [16, 128], strides = [1, 1]} : vector<16x256xbf16> to vector<16x128xbf16>
      %cst_37 = arith.constant dense<0.000000e+00> : vector<128x16xf32>
      %66 = tpu.matmul %64, %65, %cst_37 {dimension_numbers = #tpu.dot_dimension_numbers<[1], [1], [0], [0], [0, 0, 1, 0], [], []>} : vector<128x128xbf16>, vector<16x128xbf16>, vector<128x16xf32> -> vector<128x16xf32>
      %cst_38 = arith.constant 0.000000e+00 : bf16
      %67 = vector.broadcast %cst_38 : bf16 to vector<128x128xbf16>
      %c0_39 = arith.constant 0 : index
      %c0_40 = arith.constant 0 : index
      %68 = vector.load %arg10[%c0_39, %c0_40] : memref<128x128xbf16, #tpu.memory_space<vmem>>, vector<128x128xbf16>
      tpu.vector_store %arg10[%c0_39, %c0_40], %67 {strides = array<i32>} : memref<128x128xbf16, #tpu.memory_space<vmem>>, vector<128x128xbf16>,
      %69 = arith.truncf %66 : vector<128x16xf32> to vector<128x16xbf16>
      %c0_41 = arith.constant 0 : index
      %c0_42 = arith.constant 0 : index
      %70 = vector.load %arg10[%c0_41, %c0_42] : memref<128x128xbf16, #tpu.memory_space<vmem>>, vector<128x16xbf16>
      tpu.vector_store %arg10[%c0_41, %c0_42], %69 {strides = array<i32>} : memref<128x128xbf16, #tpu.memory_space<vmem>>, vector<128x16xbf16>,
    } else {
    }
    %c16_i32 = arith.constant 16 : i32
    %3 = arith.muli %arg1, %c16_i32 : i32
    %4 = tpu.assume_multiple %3, 16 : i32
    %5 = arith.index_cast %4 : i32 to index
    %c0 = arith.constant 0 : index
    %6 = vector.load %arg9[%5, %c0] : memref<16x128xbf16, #tpu.memory_space<vmem>>, vector<16x128xbf16>
    %c0_1 = arith.constant 0 : index
    %c0_2 = arith.constant 0 : index
    %7 = vector.load %arg10[%c0_1, %c0_2] : memref<128x128xbf16, #tpu.memory_space<vmem>>, vector<128x128xbf16>
    %cst = arith.constant dense<0.000000e+00> : vector<16x128xf32>
    %8 = tpu.matmul %6, %7, %cst {dimension_numbers = #tpu.dot_dimension_numbers<[1], [0], [0], [1], [0, 0, 1, 1], [], []>} : vector<16x128xbf16>, vector<128x128xbf16>, vector<16x128xf32> -> vector<16x128xf32>
    %9 = tpu.iota {dimensions = array<i32: 0>} : vector<16x128xi32>
    %c16_i32_3 = arith.constant 16 : i32
    %10 = arith.muli %arg1, %c16_i32_3 : i32
    %11 = vector.broadcast %10 : i32 to vector<16x128xi32>
    %12 = arith.addi %9, %11 : vector<16x128xi32>
    %13 = tpu.iota {dimensions = array<i32: 1>} : vector<16x128xi32>
    %c0_4 = arith.constant 0 : index
    %c0_5 = arith.constant 0 : index
    %c0_6 = arith.constant 0 : index
    %14 = vector.load %arg7[%c0_4, %c0_5, %c0_6] : memref<1x16x1xf32, #tpu.memory_space<vmem>>, vector<1x16x1xf32>
    %15 = vector.shape_cast %14 : vector<1x16x1xf32> to vector<16x1xf32>
    %cst_7 = arith.constant 0.000000e+00 : f32
    %16 = vector.broadcast %cst_7 : f32 to vector<16x1xf32>
    %17 = arith.cmpf ogt, %15, %16 : vector<16x1xf32>
    %c0_i32_8 = arith.constant 0 : i32
    %18 = vector.broadcast %c0_i32_8 : i32 to vector<16x128xi32>
    %19 = arith.cmpi eq, %13, %18 : vector<16x128xi32>
    %20 = vector.broadcast %17 : vector<16x1xi1> to vector<16x128xi1>
    %21 = arith.andi %20, %19 : vector<16x128xi1>
    %22 = arith.cmpi sge, %13, %12 : vector<16x128xi32>
    %23 = vector.broadcast %17 : vector<16x1xi1> to vector<16x128xi1>
    %24 = arith.ori %23, %22 : vector<16x128xi1>
    %cst_9 = arith.constant 0xFF800000 : f32
    %25 = vector.broadcast %cst_9 : f32 to vector<16x128xf32>
    %26 = arith.select %24, %25, %8 : vector<16x128xi1>, vector<16x128xf32>
    %cst_10 = arith.constant 0.000000e+00 : f32
    %27 = vector.broadcast %cst_10 : f32 to vector<16x128xf32>
    %28 = arith.select %21, %27, %26 : vector<16x128xi1>, vector<16x128xf32>
    %c0_11 = arith.constant 0 : index
    %c0_12 = arith.constant 0 : index
    %c0_13 = arith.constant 0 : index
    %29 = vector.load %arg8[%c0_11, %c0_12, %c0_13] : memref<1x16x128xf32, #tpu.memory_space<vmem>>, vector<1x16x128xf32>
    %30 = vector.shape_cast %29 : vector<1x16x128xf32> to vector<16x128xf32>
    %31 = vector.shape_cast %28 : vector<16x128xf32> to vector<1x16x128xf32>
    tpu.vector_store %arg8[%c0_11, %c0_12, %c0_13], %31 {strides = array<i32>} : memref<1x16x128xf32, #tpu.memory_space<vmem>>, vector<1x16x128xf32>,
    return
  }
  func.func @transform_0(%arg0: i32, %arg1: i32) -> i32 {
    %c0_i32 = arith.constant 0 : i32
    %c0_i32_0 = arith.constant 0 : i32
    return %c0_i32 : i32
  }
  func.func @transform_1(%arg0: i32, %arg1: i32) -> (i32, i32, i32, i32) {
    %c0_i32 = arith.constant 0 : i32
    %c0_i32_0 = arith.constant 0 : i32
    %c0_i32_1 = arith.constant 0 : i32
    %c0_i32_2 = arith.constant 0 : i32
    return %arg0, %c0_i32, %c0_i32_0, %c0_i32_1 : i32, i32, i32, i32
  }
  func.func @transform_2(%arg0: i32, %arg1: i32) -> (i32, i32) {
    %c0_i32 = arith.constant 0 : i32
    %c0_i32_0 = arith.constant 0 : i32
    %c0_i32_1 = arith.constant 0 : i32
    return %c0_i32, %c0_i32_0 : i32, i32
  }
  func.func @transform_3(%arg0: i32, %arg1: i32) -> (i32, i32) {
    %c0_i32 = arith.constant 0 : i32
    %c0_i32_0 = arith.constant 0 : i32
    %c0_i32_1 = arith.constant 0 : i32
    return %c0_i32, %c0_i32_0 : i32, i32
  }
  func.func @transform_4(%arg0: i32, %arg1: i32) -> (i32, i32) {
    %c0_i32 = arith.constant 0 : i32
    %c0_i32_0 = arith.constant 0 : i32
    %c0_i32_1 = arith.constant 0 : i32
    return %c0_i32, %c0_i32_0 : i32, i32
  }
  func.func @transform_5(%arg0: i32, %arg1: i32) -> (i32, i32, i32) {
    %c0_i32 = arith.constant 0 : i32
    %c0_i32_0 = arith.constant 0 : i32
    return %arg0, %arg1, %c0_i32 : i32, i32, i32
  }
  func.func @transform_6(%arg0: i32, %arg1: i32) -> (i32, i32, i32) {
    %c0_i32 = arith.constant 0 : i32
    %c0_i32_0 = arith.constant 0 : i32
    return %arg0, %arg1, %c0_i32 : i32, i32, i32
  }
}

</mosaic_0001>

<bundles_post_ra>
// kernel: bilinear_aligner_forward.1
= control target key start
LH: loop header
LB: loop body
LE: loop exit
PB: predicated region body
PF: predicated region fallthrough
CT: control target
= control target key end

     0   :  { %s1536_s0 = inlined_call_operand.vmem [shape: f32[3], index: 0, kind: input, shape index: {}]   ;;  %s1537_s1 = inlined_call_operand.vmem [shape: bf16[2,3,16,128], index: 1, kind: input, shape index: {}]   ;;  %s1538_s2 = inlined_call_operand.vmem [shape: bf16[128,256], index: 2, kind: input, shape index: {}]   ;;  %s1539_s3 = inlined_call_operand.vmem [shape: f32[1,256], index: 3, kind: input, shape index: {}]   ;;  %s1540_s4 = inlined_call_operand.vmem [shape: bf16[128,128], index: 4, kind: input, shape index: {}]   ;;  %s1541_s5 = inlined_call_operand.vmem [shape: f32[2,16,1], index: 5, kind: input, shape index: {}]   ;;  %s1542_s6 = inlined_call_operand.hbm [shape: f32[2,16,128], index: 6, kind: output, shape index: {}]  }
   0x1   :  { %1543 = sst [smem:[#allocation10_spill]] %s1536_s0 }
   0x2   :  { %11 = vsyncpa [#allocation6], 0 }
   0x3   :  { %12 = vsyncpa [#allocation5], 0 }
   0x4   :  { %14 = vsyncpa [#allocation5 + $0x1], 0  ;;  %s1274_s21 = smov 0   ;;  %s1276_s22 = smov 0  }
   0x5   :  { %s1278_s23 = smov 0   ;;  %s1280_s24 = smov 0  }
   0x6   :  { %s1282_s25 = smov 0   ;;  %s1284_s26 = smov 0  }
   0x7 LB: > { %s910_s27 = sadd.s32 4294967295, %s1230_s26   ;;  %s911_s28 = sadd.s32 4294967294, %s1230_s26   ;;  %s1230_s26 = sphi %s1284_s26, %s20_s26   ;;  %s1226_s25 = sphi %s1282_s25, %s1553_s25   ;;  %s1222_s24 = sphi %s1280_s24, %s1552_s24   ;;  %s1218_s23 = sphi %s1278_s23, %s1551_s23   ;;  %s1214_s22 = sphi %s1276_s22, %s1550_s22   ;;  %s1210_s21 = sphi %s1274_s21, %s1549_s21  }
   0x8   : > { %s32_s29 = sadd.s32 1, %s1226_s25  ;;  %s179_s30 = sadd.s32 1, %s1218_s23 }
   0x9   : > { %p34_p0 = scmp.ge.s32.totalorder %s32_s29, 2  ;;  %p189_p1 = scmp.ne.s32.totalorder %s1218_s23, %s1214_s22 }
   0xa   : > { %p190_p2 = scmp.eq.s32.totalorder %s910_s27, 1  ;;  %p195_p3 = scmp.ne.s32.totalorder %s1214_s22, %s1210_s21 }
   0xb   : > { %s1555_s29 = smov (%p34_p0, %s32_s29), 0  ;;  %p196_p5 = scmp.eq.s32.totalorder %s911_s28, 1 }
   0xc   : > { %p1314_p4 = por %p190_p2, %p189_p1  ;;  %s174_s8 = ssub.s32 %s1226_s25, %s1555_s29 }
   0xd   : > { %p912_p6 = scmp.ge.s32.totalorder %s1230_s26, 1  ;;  %p177_p7 = scmp.eq.s32.totalorder %s174_s8, 0 }
   0xe   : > { %p1321_p8 = por %p196_p5, %p195_p3  ;;  %p203_p9 = scmp.lt.s32.totalorder %s1230_s26, 3 }
   0xf   : > { %s1327_s10 = scalar_select %p177_p7, %s1218_s23, %s179_s30  }
  0x10   : > { %p1329_p10 = pnand %p912_p6, %p203_p9  ;;  %p1333_p11 = scmp.eq.s32.totalorder %s910_s27, 0 }
  0x11   : > { %s1548_s0 = sld [smem:[#allocation10_spill]] }
  0x12   : > { %p1035_p12 = pneg %p1329_p10 }
  0x14   : > { %p1036_p13 = pnand %p1333_p11, %p1035_p12 }
  0x16   : > { %p1135_p1 = pneg %p1036_p13 }
  0x17   : > { %s216_s15 = sshll.u32 %s1548_s0, 4  ;;  %s217_s15 = int_to_ptr.vmem [resolvable:$true] %s216_s15 }
  0x18   : > { %s1133_s16 = scalar_lea.vmem %s217_s15, 16  ;;  %p1141_p5 = scmp.lt.s32.totalorder %s217_s15, %s217_s15 }
  0x19   : > { %p1134_p0 = scmp.ne.s32.totalorder %s217_s15, %s1133_s16  ;;  %p1142_p6 = scmp.lt.s32.totalorder %s1133_s16, %s1133_s16 }
  0x1b   : > { %p1136_p2 = pnand %p1135_p1, %p1134_p0  ;;  %p1143_p7 = por %p1142_p6, %p1141_p5 }
  0x1d   : > { %p1137_p3 = pneg %p1136_p2 }
  0x1f   : > { %p1144_p9 = pnand %p1143_p7, %p1137_p3 }
  0x21   : > { %1147 = shalt.err (!%p1144_p9)
}
  0x22   : > { %s1232_s17 = smov [#allocation4]   ;;  %259 = sbr.rel (%p1329_p10) target bundleno = 795 (0x31b), region = 44 }
  0x23   : > { %1038 = dma.vmem_to_smem (!%p1036_p13), %s217_s15, 16, %s1232_s17, [#allocation6]  }
  0x29   : > { %1201 = dma.done.wait (%p1333_p11), [#allocation6], 16  }
  0x2a   : > { %1203 = vsyncadd (%p1333_p11), [#allocation6], 4294967280 }
  0x2b   : > { %265 = sfence }
  0x2c   : > { %v1101_v0 = vld [vmem:[%s1538_s2 + $0x4] ss:$8 sps:$4 sm:$0xff]   ;;  %p299_p12 = scmp.lt.s32.totalorder %s1222_s24, 1  ;;  %v1103_v1 = vld [vmem:[%s1538_s2] ss:$8 sps:$4 sm:$0xff]   ;;  %v1233_v2 = vmov 0   ;;  %v369_v41 = vlaneseq }
  0x2d   : > { %491 = vmatprep.mubr.bf16.mxu0 %v1233_v2  ;;  %674 = vst [vmem:[#allocation3] sm:$0xff] %v1233_v2  ;;  %675 = vst [vmem:[#allocation3 + $0x8] sm:$0xff] %v1233_v2  ;;  %1100 = vset.pattern.permute.xlu0 %v1233_v2  ;;  %v1104_v3 = vld [vmem:[%s1538_s2 + $0x14] ss:$8 sps:$4 sm:$0xff]   ;;  %v1106_v4 = vld [vmem:[%s1538_s2 + $0x10] ss:$8 sps:$4 sm:$0xff]  }
  0x2e   : > { %676 = vst [vmem:[#allocation3 + $0x10] sm:$0xff] %v1233_v2  ;;  %677 = vst [vmem:[#allocation3 + $0x18] sm:$0xff] %v1233_v2  ;;  %459 = vmatprep.subr.bf16.mxu0 %v1101_v0  ;;  %s1373_s8 = scalar_select %p299_p12, %s1222_s24, 1  ;;  %v1107_v5 = vld [vmem:[%s1538_s2 + $0x24] ss:$8 sps:$4 sm:$0xff]   ;;  %v1422_v42 = vshrl.u32 %v369_v41, 7 }
  0x2f   : > { %678 = vst [vmem:[#allocation3 + $0x20] sm:$0xff] %v1233_v2  ;;  %679 = vst [vmem:[#allocation3 + $0x28] sm:$0xff] %v1233_v2  ;;  %460 = vmatpush1.bf16.msra.mxu0 %v1103_v1  ;;  %s320_s16 = sld [smem:[#allocation4]]  ;;  %v1109_v6 = vld [vmem:[%s1538_s2 + $0x20] ss:$8 sps:$4 sm:$0xff]   ;;  %s921_s19 = sld [smem:[#allocation4 + $0x1]] }
  0x30   : > { %680 = vst [vmem:[#allocation3 + $0x30] sm:$0xff] %v1233_v2  ;;  %681 = vst [vmem:[#allocation3 + $0x38] sm:$0xff] %v1233_v2  ;;  %461 = vmatprep.subr.bf16.mxu0 %v1104_v3  ;;  %s1028_s15 = smul.u32 24, %s1373_s8  ;;  %v1110_v7 = vld [vmem:[%s1538_s2 + $0x34] ss:$8 sps:$4 sm:$0xff]   ;;  %s924_s17 = sld [smem:[#allocation4 + $0x2]] }
  0x31   : > { %v1112_v8 = vld [vmem:[%s1538_s2 + $0x30] ss:$8 sps:$4 sm:$0xff]   ;;  %v1113_v9 = vld [vmem:[%s1538_s2 + $0x44] ss:$8 sps:$4 sm:$0xff]   ;;  %v1115_v13 = vld [vmem:[%s1538_s2 + $0x40] ss:$8 sps:$4 sm:$0xff]  }
  0x32   : > { %s303_s11 = scalar_lea.vmem %s1537_s1, %s1028_s15  ;;  %v1116_v15 = vld [vmem:[%s1538_s2 + $0x54] ss:$8 sps:$4 sm:$0xff]   ;;  %v1118_v27 = vld [vmem:[%s1538_s2 + $0x50] ss:$8 sps:$4 sm:$0xff]   ;;  %v1119_v29 = vld [vmem:[%s1538_s2 + $0x64] ss:$8 sps:$4 sm:$0xff]  }
  0x33   : > { %462 = vmatpush1.bf16.msra.mxu0 %v1106_v4  ;;  %v959_v10 = vld [vmem:[%s303_s11] sm:$0xff]   ;;  %v970_v11 = vld [vmem:[%s303_s11 + $0x8] sm:$0xff]   ;;  %v971_v12 = vld [vmem:[%s303_s11 + $0x10] sm:$0xff]   ;;  %v371_v43 = vsub.s32 0, %v1422_v42  ;;  %v375_v45 = vsub.s32 1, %v1422_v42  ;;  %vm1235_vm0 = vmmov 0  }
  0x34   : > { %463 = vmatprep.subr.bf16.mxu0 %v1107_v5  ;;  %v960_v16 = vunpack.c.l.bf16 %v959_v10  ;;  %v961_v17 = vunpack.c.h.bf16 %v959_v10  ;;  %v964_v18 = vunpack.c.l.bf16 %v970_v11  ;;  %v965_v19 = vunpack.c.h.bf16 %v970_v11  ;;  %v1121_v34 = vld [vmem:[%s1538_s2 + $0x60] ss:$8 sps:$4 sm:$0xff]   ;;  %v1122_v35 = vld [vmem:[%s1538_s2 + $0x74] ss:$8 sps:$4 sm:$0xff]   ;;  %v1124_v38 = vld [vmem:[%s1538_s2 + $0x70] ss:$8 sps:$4 sm:$0xff]  }
  0x35   : > { %v325_v14 = vstv %s320_s16  ;;  %v334_v20 = vstv %s921_s19  ;;  %v968_v21 = vunpack.c.l.bf16 %v971_v12  ;;  %v969_v22 = vunpack.c.h.bf16 %v971_v12  ;;  %v1125_v40 = vld [vmem:[%s1540_s4] sm:$0xff]   ;;  %v1126_v3 = vld [vmem:[%s1540_s4 + $0x8] sm:$0xff]   ;;  %s956_s0 = sshll.u32 %s1373_s8, 4  ;;  %s296_s8 = sand.u32 1, %s1214_s22  }
  0x36   : > { %v326_v23 = vmul.f32 %v960_v16, %v325_v14  ;;  %v327_v24 = vmul.f32 %v961_v17, %v325_v14  ;;  %v335_v25 = vmul.f32 %v964_v18, %v334_v20  ;;  %v336_v26 = vmul.f32 %v965_v19, %v334_v20  ;;  %992 = vmatprep.mubr.bf16.mxu1 %v1125_v40  ;;  %v367_v44 = vld [vmem:[%s1539_s3] sm:$0x3]  ;;  %v1127_v4 = vld [vmem:[%s1540_s4 + $0x10] sm:$0xff]   ;;  %v1128_v5 = vld [vmem:[%s1540_s4 + $0x18] sm:$0xff]   ;;  %s312_s30 = scalar_lea.vmem %s1541_s5, %s956_s0  ;;  %s917_s19 = sshll.u32 %s296_s8, 4 }
  0x37   : > { %464 = vmatpush1.bf16.msra.mxu0 %v1109_v6  ;;  %v345_v28 = vstv %s924_s17  ;;  %v372_v46 = vrot.slane %v367_v44, %v371_v43  ;;  %v376_v47 = vrot.slane %v367_v44, %v375_v45  ;;  %v1129_v6 = vld [vmem:[%s1540_s4 + $0x20] sm:$0xff]   ;;  %v1234_v10 = vmov 0.0   ;;  %v763_v12 = vld [vmem:[%s312_s30 + $0x8] sm:$0xff]  ;;  %s298_s11 = scalar_lea.vmem [#allocation7], %s917_s19  ;;  %s957_s13 = sshll.u32 %s1222_s24, 8 }
  0x38   : > { %465 = vmatprep.subr.bf16.mxu0 %v1110_v7  ;;  %v337_v30 = vadd.f32 %v335_v25, %v326_v23  ;;  %v338_v31 = vadd.f32 %v336_v26, %v327_v24  ;;  %v346_v32 = vmul.f32 %v968_v21, %v345_v28  ;;  %v347_v33 = vmul.f32 %v969_v22, %v345_v28  ;;  %v1130_v7 = vld [vmem:[%s1540_s4 + $0x28] sm:$0xff]   ;;  %v762_v11 = vld [vmem:[%s312_s30] sm:$0xff]  ;;  %s805_s12 = sshll.u32 %s298_s11, 4  ;;  %s1487_s18 = scalar_lea.hbm %s1542_s6, %s957_s13  ;;  %s1482_s12 = int_to_ptr.vmem [resolvable:$true] %s805_s12 }
  0x39   : > { %vm764_vm1 = vcmp.gt.f32.partialorder %v762_v11, 0.0  ;;  %vm765_vm2 = vcmp.gt.f32.partialorder %v763_v12, 0.0  ;;  %vm690_vm3 = vcmask 130048   ;;  %s1490_s24 = scalar_lea.sflag [#allocation5], %s296_s8  ;;  %s1148_s20 = scalar_lea.vmem %s1482_s12, 256 }
  0x3a   : > { %v348_v36 = vadd.f32 %v346_v32, %v337_v30  ;;  %v349_v37 = vadd.f32 %v347_v33, %v338_v31  ;;  %v768_v14 = vsel %vm765_vm2, 1, %v1233_v2  ;;  %p1149_p10 = scmp.ne.s32.totalorder %s1482_s12, %s1148_s20  ;;  %s1236_s15 = smov [#allocation7]  }
  0x3b   : > { %466 = vmatpush1.bf16.msra.mxu0 %v1112_v8  ;;  %v1131_v8 = vld [vmem:[%s1540_s4 + $0x30] sm:$0xff]   ;;  %s1152_s27 = sshll.u32 %s1236_s15, 4  ;;  %s1153_s27 = int_to_ptr.vmem [resolvable:$false] %s1152_s27 }
  0x3c   : > { %467 = vmatprep.subr.bf16.mxu0 %v1113_v9  ;;  %v350_v39 = vpack.c.bf16 %v349_v37, %v348_v36  ;;  %v1132_v9 = vld [vmem:[%s1540_s4 + $0x38] sm:$0xff]   ;;  %p1150_p11 = pnand %p1149_p10, %p1314_p4  ;;  %s1154_s0 = scalar_lea.vmem %s1153_s27, 512 }
  0x3d   : > { %p1155_p0 = scmp.lt.s32.totalorder %s1482_s12, %s1153_s27  ;;  %p1156_p1 = scmp.lt.s32.totalorder %s1154_s0, %s1148_s20 }
  0x3e   : > { %p1151_p13 = pneg %p1150_p11 }
  0x3f   : > { %468 = vmatpush1.bf16.msra.mxu0 %v1115_v13  ;;  %v767_v13 = vsel %vm764_vm1, 1, %v1233_v2  ;;  %p1157_p2 = por %p1156_p1, %p1155_p0 }
  0x40   : > { %469 = vmatprep.subr.bf16.mxu0 %v1116_v15  ;;  %770 = vperm.xlu0 %1100, %v767_v13  }
  0x41   : > { %p1158_p3 = pnand %p1157_p2, %p1151_p13 }
  0x43   : > { %470 = vmatpush1.bf16.msra.mxu0 %v1118_v27 }
  0x44   : > { %471 = vmatprep.subr.bf16.mxu0 %v1119_v29  ;;  %773 = vperm.xlu0 %1100, %v768_v14  }
  0x47   : > { %472 = vmatpush1.bf16.msra.mxu0 %v1121_v34 }
  0x48   : > { %473 = vmatprep.subr.bf16.mxu0 %v1122_v35 }
  0x4b   : > { %474 = vmatpush1.bf16.msra.mxu0 %v1124_v38 }
  0x4e   : > { %492 = vmatmul.mubr.bf16.vlgmr.msra.gmra.mrb[0].mxu0 %v350_v39 }
 0x121   : > { %v493_v48 = vpop.f32.mrb[0].mxu0 }
 0x122   : > { %v494_v49 = vadd.f32 %v493_v48, %v372_v46  ;;  %v495_v50 = vpop.f32.mrb[1].mxu0  ;;  %v771_v48 = vpop.permute.xlu0 %770 }
 0x123   : > { %v496_v51 = vadd.f32 %v495_v50, %v376_v47  ;;  %v497_v52 = vpop.f32.mrb[2].mxu0  ;;  %v756_v50 = vadd.s32 8, %v1422_v42  ;;  %vm775_vm4 = vcmp.eq.s32.totalorder %v771_v48, 1 }
 0x124   : > { %v502_v53 = vmul.f32 0.01, %v494_v49  ;;  %v498_v54 = vadd.f32 %v497_v52, %v372_v46  ;;  %v499_v55 = vpop.f32.mrb[3].mxu0 }
 0x125   : > { %v503_v56 = vmul.f32 0.01, %v496_v51  ;;  %v500_v57 = vadd.f32 %v499_v55, %v376_v47 }
 0x126   : > { %v504_v58 = vmul.f32 0.01, %v498_v54  ;;  %v506_v60 = vmax.f32 %v494_v49, %v502_v53  ;;  %v761_v49 = vand.u32 127, %v369_v41 }
 0x127   : > { %v505_v59 = vmul.f32 0.01, %v500_v57  ;;  %v507_v62 = vmax.f32 %v496_v51, %v503_v56  ;;  %v774_v51 = vpop.permute.xlu0 %773 }
 0x128   : > { %v508_v61 = vmax.f32 %v498_v54, %v504_v58  ;;  %vm779_vm5 = vcmp.ge.s32.totalorder %v761_v49, %v1422_v42  ;;  %vm766_vm6 = vcmp.eq.s32.totalorder %v761_v49, 0  ;;  %vm780_vm7 = vcmp.ge.s32.totalorder %v761_v49, %v756_v50 }
 0x129   : > { %v509_v63 = vmax.f32 %v500_v57, %v505_v59  ;;  %vm776_vm8 = vcmp.eq.s32.totalorder %v774_v51, 1  ;;  %vm781_vm9 = vmor %vm775_vm4, %vm779_vm5 }
 0x12a   : > { %v510_v0 = vpack.c.bf16 %v508_v61, %v506_v60  ;;  %vm777_vm10 = vmand %vm775_vm4, %vm766_vm6 }
 0x12b   : > { %v1429_v1 = vpack.c.bf16 %v509_v63, %v507_v62  ;;  %vm782_vm11 = vmor %vm776_vm8, %vm780_vm7 }
 0x12c   : > { %990 = vmatprep.subr.bf16.mxu1 %v510_v0  ;;  %vm778_vm12 = vmand %vm776_vm8, %vm766_vm6 }
 0x12d   : > { %991 = vmatpush3.bf16.xpose.msra.mxu1 %v510_v0 }
 0x12e   : > { %1008 = vmatprep.subr.bf16.mxu1 %v1234_v10 }
 0x134   : > { %993 = vmatmul.mubr.bf16.vlgmr.msra.gmra.mrb[0].mxu1 %v1126_v3 }
 0x135   : > { %996 = vmatprep.mubr.bf16.mxu1 %v1127_v4 }
 0x13c   : > { %997 = vmatmul.mubr.bf16.gmra.mrb[4].mxu1 %v1128_v5 }
 0x13d   : > { %1000 = vmatprep.mubr.bf16.mxu1 %v1129_v6 }
 0x144   : > { %1001 = vmatmul.mubr.bf16.gmra.mrb[8].mxu1 %v1130_v7 }
 0x145   : > { %1004 = vmatprep.mubr.bf16.mxu1 %v1131_v8 }
 0x14c   : > { %1005 = vmatmul.mubr.bf16.gmra.mrb[12].mxu1 %v1132_v9 }
 0x14d   : > { %1024 = vmatprep.mubr.msk.bf16.mxu1 %vm1235_vm0, %v1234_v10 }
 0x207   : > { %v994_v15 = vpop.f32.mrb[0].mxu1 }
 0x208   : > { %v611_v16 = vpop.f32.mrb[1].mxu1 }
 0x209   : > { %v995_v17 = vpop.f32.mrb[2].mxu1 }
 0x20a   : > { %v683_v18 = vpack.c.bf16 %v995_v17, %v994_v15  ;;  %v614_v19 = vpop.f32.mrb[3].mxu1 }
 0x20b   : > { %v682_v20 = vpack.c.bf16 %v614_v19, %v611_v16 }
 0x20c   : > { %692 = vst.msk [vmem:[#allocation3 + $0x8] sm:$0xff] %vm690_vm3, %v683_v18 }
 0x20d   : > { %691 = vst.msk [vmem:[#allocation3] sm:$0xff] %vm690_vm3, %v682_v20 }
 0x20f   : > { %v998_v21 = vpop.f32.mrb[4].mxu1 }
 0x210   : > { %v627_v22 = vpop.f32.mrb[5].mxu1 }
 0x211   : > { %v999_v23 = vpop.f32.mrb[6].mxu1 }
 0x212   : > { %v685_v24 = vpack.c.bf16 %v999_v23, %v998_v21  ;;  %v630_v25 = vpop.f32.mrb[7].mxu1 }
 0x213   : > { %v684_v26 = vpack.c.bf16 %v630_v25, %v627_v22  ;;  %v706_v29 = vld [vmem:[#allocation3 + $0x8] sm:$0xff] }
 0x214   : > { %694 = vst.msk [vmem:[#allocation3 + $0x18] sm:$0xff] %vm690_vm3, %v685_v24  ;;  %v705_v2 = vld [vmem:[#allocation3] sm:$0xff] }
 0x215   : > { %693 = vst.msk [vmem:[#allocation3 + $0x10] sm:$0xff] %vm690_vm3, %v684_v26  ;;  %1009 = vmatpush3.bf16.msra.mxu1 %v705_v2 }
 0x216   : > { %1010 = vmatprep.subr.bf16.mxu1 %v1234_v10 }
 0x217   : > { %v1002_v27 = vpop.f32.mrb[8].mxu1 }
 0x218   : > { %v643_v28 = vpop.f32.mrb[9].mxu1 }
 0x219   : > { %v1003_v30 = vpop.f32.mrb[10].mxu1  ;;  %1011 = vmatpush3.bf16.msra.mxu1 %v706_v29 }
 0x21a   : > { %v687_v31 = vpack.c.bf16 %v1003_v30, %v1002_v27  ;;  %v646_v32 = vpop.f32.mrb[11].mxu1  ;;  %1012 = vmatprep.subr.bf16.mxu1 %v1234_v10 }
 0x21b   : > { %v686_v33 = vpack.c.bf16 %v646_v32, %v643_v28  ;;  %v708_v37 = vld [vmem:[#allocation3 + $0x18] sm:$0xff] }
 0x21c   : > { %696 = vst.msk [vmem:[#allocation3 + $0x28] sm:$0xff] %vm690_vm3, %v687_v31  ;;  %v707_v34 = vld [vmem:[#allocation3 + $0x10] sm:$0xff] }
 0x21d   : > { %695 = vst.msk [vmem:[#allocation3 + $0x20] sm:$0xff] %vm690_vm3, %v686_v33  ;;  %1013 = vmatpush3.bf16.msra.mxu1 %v707_v34 }
 0x21e   : > { %1014 = vmatprep.subr.bf16.mxu1 %v1234_v10 }
 0x21f   : > { %v1006_v35 = vpop.f32.mrb[12].mxu1 }
 0x220   : > { %v659_v36 = vpop.f32.mrb[13].mxu1 }
 0x221   : > { %v1007_v38 = vpop.f32.mrb[14].mxu1  ;;  %1015 = vmatpush3.bf16.msra.mxu1 %v708_v37 }
 0x222   : > { %v689_v39 = vpack.c.bf16 %v1007_v38, %v1006_v35  ;;  %v662_v40 = vpop.f32.mrb[15].mxu1  ;;  %1016 = vmatprep.subr.bf16.mxu1 %v1234_v10 }
 0x223   : > { %v688_v43 = vpack.c.bf16 %v662_v40, %v659_v36  ;;  %v710_v45 = vld [vmem:[#allocation3 + $0x28] sm:$0xff] }
 0x224   : > { %698 = vst.msk [vmem:[#allocation3 + $0x38] sm:$0xff] %vm690_vm3, %v689_v39  ;;  %v709_v44 = vld [vmem:[#allocation3 + $0x20] sm:$0xff] }
 0x225   : > { %697 = vst.msk [vmem:[#allocation3 + $0x30] sm:$0xff] %vm690_vm3, %v688_v43  ;;  %1017 = vmatpush3.bf16.msra.mxu1 %v709_v44 }
 0x226   : > { %1018 = vmatprep.subr.bf16.mxu1 %v1234_v10 }
 0x229   : > { %1019 = vmatpush3.bf16.msra.mxu1 %v710_v45 }
 0x22a   : > { %1020 = vmatprep.subr.bf16.mxu1 %v1234_v10 }
 0x22b   : > { %v712_v47 = vld [vmem:[#allocation3 + $0x38] sm:$0xff] }
 0x22c   : > { %v711_v46 = vld [vmem:[#allocation3 + $0x30] sm:$0xff] }
 0x22d   : > { %1021 = vmatpush3.bf16.msra.mxu1 %v711_v46 }
 0x22e   : > { %1022 = vmatprep.subr.bf16.mxu1 %v1234_v10 }
 0x231   : > { %1023 = vmatpush3.bf16.msra.mxu1 %v712_v47 }
 0x234   : > { %1025 = vmatmul.mubr.bf16.vlgmr.msra.gmra.mrb[16].mxu1 %v1429_v1 }
 0x307   : > { %v747_v52 = vpop.f32.mrb[16].mxu1 }
 0x308   : > { %v783_v53 = vsel %vm781_vm9, -inf, %v747_v52  ;;  %v1026_v41 = vpop.f32.mrb[17].mxu1 }
 0x309   : > { %v785_v54 = vsel %vm777_vm10, 0.0, %v783_v53  ;;  %v750_v42 = vpop.f32.mrb[18].mxu1 }
 0x30a   : > { %787 = vst [vmem:[%s298_s11] sm:$0xff] %v785_v54  ;;  %v784_v55 = vsel %vm782_vm11, -inf, %v750_v42  ;;  %v1027_v56 = vpop.f32.mrb[19].mxu1 }
 0x30b   : > { %v786_v57 = vsel %vm778_vm12, 0.0, %v784_v55 }
 0x30c   : > { %788 = vst [vmem:[%s298_s11 + $0x8] sm:$0xff] %v786_v57 }
 0x30d   : > { %1161 = shalt.err (!%p1158_p3)
}
 0x30e   : > { %s1162_s16 = scalar_lea.hbm %s1487_s18, 256  ;;  %s1166_s8 = scalar_lea.hbm %s1542_s6, 512 }
 0x30f   : > { %p1163_p5 = scmp.ne.s32.totalorder %s1487_s18, %s1162_s16  ;;  %p1167_p9 = scmp.lt.u32.totalorder %s1487_s18, %s1542_s6 }
 0x310   : > { %p1168_p12 = scmp.lt.u32.totalorder %s1166_s8, %s1162_s16  ;;  %p1170_p11 = scmp.lt.u32.totalorder %s1162_s16, %s1487_s18 }
 0x311   : > { %p1164_p6 = pnand %p1163_p5, %p1314_p4 }
 0x312   : > { %p1169_p10 = por %p1168_p12, %p1167_p9 }
 0x313   : > { %p1165_p7 = pneg %p1164_p6 }
 0x314   : > { %p1171_p13 = por %p1170_p11, %p1169_p10 }
 0x316   : > { %p1172_p0 = pnand %p1171_p13, %p1165_p7 }
 0x318   : > { %1175 = shalt.err (!%p1172_p0)
}
 0x319   : > { %s1237_s13 = smov 128   ;;  %s1238_s14 = smov 8  }
 0x31a   : > { %1033 = dma.vmem_to_hbm [thread:$0]  (%p1314_p4), %s1482_s12, 256, %s1487_s18, %s1490_s24, %s1237_s13, %s1237_s13, %s1238_s14  }
 0x31b PF: > { %p1045_p1 = scmp.ge.s32.totalorder %s1230_s26, 2  ;;  %s820_s17 = sand.u32 1, %s1210_s21  }
 0x31c   : > { %s821_s20 = scalar_lea.sflag [#allocation5], %s820_s17 }
 0x31d   : > { %p1040_p2 = pnand %p1045_p1, %p1321_p8 }
 0x31f   : > { %1205 = dma.done.wait (!%p1040_p2), %s821_s20, 256  }
 0x320   : > { %1207 = vsyncadd (!%p1040_p2), %s821_s20, 4294967040  ;;  %s20_s26 = sadd.s32 1, %s1230_s26   ;;  %s1549_s21 = smov %s1214_s22 }
 0x321   : > { %p17_p3 = scmp.ge.s32.totalorder %s20_s26, 4   ;;  %s1550_s22 = smov %s1218_s23 }
 0x322   : > { %s1551_s23 = smov %s1327_s10  ;;  %s1552_s24 = smov %s1226_s25 }
 0x323   : > { %s1553_s25 = smov %s1555_s29  ;;  %19 = sbr.rel (!%p17_p3) target bundleno = 7 (0x7), region = 94 }
 0x32a   :  { %826 = vsyncpa [#allocation5], 1 }
 0x32b   :  { %828 = vsyncpa [#allocation5 + $0x1], 1 }
 0x32c   :  { %829 = vsyncpa [#allocation6], 1 }
 0x32d   :  { %831 = vsyncpa [#allocation6 + $0x1], 1 }

// kernel: bilinear_aligner_forward.1
= control target key start
LH: loop header
LB: loop body
LE: loop exit
PB: predicated region body
PF: predicated region fallthrough
CT: control target
= control target key end

     0   :  { %s1536_s0 = inlined_call_operand.vmem [shape: f32[3], index: 0, kind: input, shape index: {}]   ;;  %s1537_s1 = inlined_call_operand.vmem [shape: bf16[2,3,16,128], index: 1, kind: input, shape index: {}]   ;;  %s1538_s2 = inlined_call_operand.vmem [shape: bf16[128,256], index: 2, kind: input, shape index: {}]   ;;  %s1539_s3 = inlined_call_operand.vmem [shape: f32[1,256], index: 3, kind: input, shape index: {}]   ;;  %s1540_s4 = inlined_call_operand.vmem [shape: bf16[128,128], index: 4, kind: input, shape index: {}]   ;;  %s1541_s5 = inlined_call_operand.vmem [shape: f32[2,16,1], index: 5, kind: input, shape index: {}]   ;;  %s1542_s6 = inlined_call_operand.hbm [shape: f32[2,16,128], index: 6, kind: output, shape index: {}]  }
   0x1   :  { %1543 = sst [smem:[#allocation10_spill]] %s1536_s0 }
   0x2   :  { %11 = vsyncpa [#allocation6], 0 }
   0x3   :  { %12 = vsyncpa [#allocation5], 0 }
   0x4   :  { %14 = vsyncpa [#allocation5 + $0x1], 0  ;;  %s1274_s21 = smov 0   ;;  %s1276_s22 = smov 0  }
   0x5   :  { %s1278_s23 = smov 0   ;;  %s1280_s24 = smov 0  }
   0x6   :  { %s1282_s25 = smov 0   ;;  %s1284_s26 = smov 0  }
   0x7 LB: > { %s910_s27 = sadd.s32 4294967295, %s1230_s26   ;;  %s911_s28 = sadd.s32 4294967294, %s1230_s26   ;;  %s1230_s26 = sphi %s1284_s26, %s20_s26   ;;  %s1226_s25 = sphi %s1282_s25, %s1553_s25   ;;  %s1222_s24 = sphi %s1280_s24, %s1552_s24   ;;  %s1218_s23 = sphi %s1278_s23, %s1551_s23   ;;  %s1214_s22 = sphi %s1276_s22, %s1550_s22   ;;  %s1210_s21 = sphi %s1274_s21, %s1549_s21  }
   0x8   : > { %s32_s29 = sadd.s32 1, %s1226_s25  ;;  %s179_s30 = sadd.s32 1, %s1218_s23 }
   0x9   : > { %p34_p0 = scmp.ge.s32.totalorder %s32_s29, 2  ;;  %p189_p1 = scmp.ne.s32.totalorder %s1218_s23, %s1214_s22 }
   0xa   : > { %p190_p2 = scmp.eq.s32.totalorder %s910_s27, 1  ;;  %p195_p3 = scmp.ne.s32.totalorder %s1214_s22, %s1210_s21 }
   0xb   : > { %s1555_s29 = smov (%p34_p0, %s32_s29), 0  ;;  %p196_p5 = scmp.eq.s32.totalorder %s911_s28, 1 }
   0xc   : > { %p1314_p4 = por %p190_p2, %p189_p1  ;;  %s174_s8 = ssub.s32 %s1226_s25, %s1555_s29 }
   0xd   : > { %p912_p6 = scmp.ge.s32.totalorder %s1230_s26, 1  ;;  %p177_p7 = scmp.eq.s32.totalorder %s174_s8, 0 }
   0xe   : > { %p1321_p8 = por %p196_p5, %p195_p3  ;;  %p203_p9 = scmp.lt.s32.totalorder %s1230_s26, 3 }
   0xf   : > { %s1327_s10 = scalar_select %p177_p7, %s1218_s23, %s179_s30  }
  0x10   : > { %p1329_p10 = pnand %p912_p6, %p203_p9  ;;  %p1333_p11 = scmp.eq.s32.totalorder %s910_s27, 0 }
  0x11   : > { %s1548_s0 = sld [smem:[#allocation10_spill]] }
  0x12   : > { %p1035_p12 = pneg %p1329_p10 }
  0x14   : > { %p1036_p13 = pnand %p1333_p11, %p1035_p12 }
  0x16   : > { %p1135_p1 = pneg %p1036_p13 }
  0x17   : > { %s216_s15 = sshll.u32 %s1548_s0, 4  ;;  %s217_s15 = int_to_ptr.vmem [resolvable:$true] %s216_s15 }
  0x18   : > { %s1133_s16 = scalar_lea.vmem %s217_s15, 16  ;;  %p1141_p5 = scmp.lt.s32.totalorder %s217_s15, %s217_s15 }
  0x19   : > { %p1134_p0 = scmp.ne.s32.totalorder %s217_s15, %s1133_s16  ;;  %p1142_p6 = scmp.lt.s32.totalorder %s1133_s16, %s1133_s16 }
  0x1b   : > { %p1136_p2 = pnand %p1135_p1, %p1134_p0  ;;  %p1143_p7 = por %p1142_p6, %p1141_p5 }
  0x1d   : > { %p1137_p3 = pneg %p1136_p2 }
  0x1f   : > { %p1144_p9 = pnand %p1143_p7, %p1137_p3 }
  0x21   : > { %1147 = shalt.err (!%p1144_p9)
}
  0x22   : > { %s1232_s17 = smov [#allocation4]   ;;  %259 = sbr.rel (%p1329_p10) target bundleno = 795 (0x31b), region = 44 }
  0x23   : > { %1038 = dma.vmem_to_smem (!%p1036_p13), %s217_s15, 16, %s1232_s17, [#allocation6]  }
  0x29   : > { %1201 = dma.done.wait (%p1333_p11), [#allocation6], 16  }
  0x2a   : > { %1203 = vsyncadd (%p1333_p11), [#allocation6], 4294967280 }
  0x2b   : > { %265 = sfence }
  0x2c   : > { %v1101_v0 = vld [vmem:[%s1538_s2 + $0x4] ss:$8 sps:$4 sm:$0xff]   ;;  %p299_p12 = scmp.lt.s32.totalorder %s1222_s24, 1  ;;  %v1103_v1 = vld [vmem:[%s1538_s2] ss:$8 sps:$4 sm:$0xff]   ;;  %v1233_v2 = vmov 0   ;;  %v369_v41 = vlaneseq }
  0x2d   : > { %491 = vmatprep.mubr.bf16.mxu0 %v1233_v2  ;;  %674 = vst [vmem:[#allocation3] sm:$0xff] %v1233_v2  ;;  %675 = vst [vmem:[#allocation3 + $0x8] sm:$0xff] %v1233_v2  ;;  %1100 = vset.pattern.permute.xlu0 %v1233_v2  ;;  %v1104_v3 = vld [vmem:[%s1538_s2 + $0x14] ss:$8 sps:$4 sm:$0xff]   ;;  %v1106_v4 = vld [vmem:[%s1538_s2 + $0x10] ss:$8 sps:$4 sm:$0xff]  }
  0x2e   : > { %676 = vst [vmem:[#allocation3 + $0x10] sm:$0xff] %v1233_v2  ;;  %677 = vst [vmem:[#allocation3 + $0x18] sm:$0xff] %v1233_v2  ;;  %459 = vmatprep.subr.bf16.mxu0 %v1101_v0  ;;  %s1373_s8 = scalar_select %p299_p12, %s1222_s24, 1  ;;  %v1107_v5 = vld [vmem:[%s1538_s2 + $0x24] ss:$8 sps:$4 sm:$0xff]   ;;  %v1422_v42 = vshrl.u32 %v369_v41, 7 }
  0x2f   : > { %678 = vst [vmem:[#allocation3 + $0x20] sm:$0xff] %v1233_v2  ;;  %679 = vst [vmem:[#allocation3 + $0x28] sm:$0xff] %v1233_v2  ;;  %460 = vmatpush1.bf16.msra.mxu0 %v1103_v1  ;;  %s320_s16 = sld [smem:[#allocation4]]  ;;  %v1109_v6 = vld [vmem:[%s1538_s2 + $0x20] ss:$8 sps:$4 sm:$0xff]   ;;  %s921_s19 = sld [smem:[#allocation4 + $0x1]] }
  0x30   : > { %680 = vst [vmem:[#allocation3 + $0x30] sm:$0xff] %v1233_v2  ;;  %681 = vst [vmem:[#allocation3 + $0x38] sm:$0xff] %v1233_v2  ;;  %461 = vmatprep.subr.bf16.mxu0 %v1104_v3  ;;  %s1028_s15 = smul.u32 24, %s1373_s8  ;;  %v1110_v7 = vld [vmem:[%s1538_s2 + $0x34] ss:$8 sps:$4 sm:$0xff]   ;;  %s924_s17 = sld [smem:[#allocation4 + $0x2]] }
  0x31   : > { %v1112_v8 = vld [vmem:[%s1538_s2 + $0x30] ss:$8 sps:$4 sm:$0xff]   ;;  %v1113_v9 = vld [vmem:[%s1538_s2 + $0x44] ss:$8 sps:$4 sm:$0xff]   ;;  %v1115_v13 = vld [vmem:[%s1538_s2 + $0x40] ss:$8 sps:$4 sm:$0xff]  }
  0x32   : > { %s303_s11 = scalar_lea.vmem %s1537_s1, %s1028_s15  ;;  %v1116_v15 = vld [vmem:[%s1538_s2 + $0x54] ss:$8 sps:$4 sm:$0xff]   ;;  %v1118_v27 = vld [vmem:[%s1538_s2 + $0x50] ss:$8 sps:$4 sm:$0xff]   ;;  %v1119_v29 = vld [vmem:[%s1538_s2 + $0x64] ss:$8 sps:$4 sm:$0xff]  }
  0x33   : > { %462 = vmatpush1.bf16.msra.mxu0 %v1106_v4  ;;  %v959_v10 = vld [vmem:[%s303_s11] sm:$0xff]   ;;  %v970_v11 = vld [vmem:[%s303_s11 + $0x8] sm:$0xff]   ;;  %v971_v12 = vld [vmem:[%s303_s11 + $0x10] sm:$0xff]   ;;  %v371_v43 = vsub.s32 0, %v1422_v42  ;;  %v375_v45 = vsub.s32 1, %v1422_v42  ;;  %vm1235_vm0 = vmmov 0  }
  0x34   : > { %463 = vmatprep.subr.bf16.mxu0 %v1107_v5  ;;  %v960_v16 = vunpack.c.l.bf16 %v959_v10  ;;  %v961_v17 = vunpack.c.h.bf16 %v959_v10  ;;  %v964_v18 = vunpack.c.l.bf16 %v970_v11  ;;  %v965_v19 = vunpack.c.h.bf16 %v970_v11  ;;  %v1121_v34 = vld [vmem:[%s1538_s2 + $0x60] ss:$8 sps:$4 sm:$0xff]   ;;  %v1122_v35 = vld [vmem:[%s1538_s2 + $0x74] ss:$8 sps:$4 sm:$0xff]   ;;  %v1124_v38 = vld [vmem:[%s1538_s2 + $0x70] ss:$8 sps:$4 sm:$0xff]  }
  0x35   : > { %v325_v14 = vstv %s320_s16  ;;  %v334_v20 = vstv %s921_s19  ;;  %v968_v21 = vunpack.c.l.bf16 %v971_v12  ;;  %v969_v22 = vunpack.c.h.bf16 %v971_v12  ;;  %v1125_v40 = vld [vmem:[%s1540_s4] sm:$0xff]   ;;  %v1126_v3 = vld [vmem:[%s1540_s4 + $0x8] sm:$0xff]   ;;  %s956_s0 = sshll.u32 %s1373_s8, 4  ;;  %s296_s8 = sand.u32 1, %s1214_s22  }
  0x36   : > { %v326_v23 = vmul.f32 %v960_v16, %v325_v14  ;;  %v327_v24 = vmul.f32 %v961_v17, %v325_v14  ;;  %v335_v25 = vmul.f32 %v964_v18, %v334_v20  ;;  %v336_v26 = vmul.f32 %v965_v19, %v334_v20  ;;  %992 = vmatprep.mubr.bf16.mxu1 %v1125_v40  ;;  %v367_v44 = vld [vmem:[%s1539_s3] sm:$0x3]  ;;  %v1127_v4 = vld [vmem:[%s1540_s4 + $0x10] sm:$0xff]   ;;  %v1128_v5 = vld [vmem:[%s1540_s4 + $0x18] sm:$0xff]   ;;  %s312_s30 = scalar_lea.vmem %s1541_s5, %s956_s0  ;;  %s917_s19 = sshll.u32 %s296_s8, 4 }
  0x37   : > { %464 = vmatpush1.bf16.msra.mxu0 %v1109_v6  ;;  %v345_v28 = vstv %s924_s17  ;;  %v372_v46 = vrot.slane %v367_v44, %v371_v43  ;;  %v376_v47 = vrot.slane %v367_v44, %v375_v45  ;;  %v1129_v6 = vld [vmem:[%s1540_s4 + $0x20] sm:$0xff]   ;;  %v1234_v10 = vmov 0.0   ;;  %v763_v12 = vld [vmem:[%s312_s30 + $0x8] sm:$0xff]  ;;  %s298_s11 = scalar_lea.vmem [#allocation7], %s917_s19  ;;  %s957_s13 = sshll.u32 %s1222_s24, 8 }
  0x38   : > { %465 = vmatprep.subr.bf16.mxu0 %v1110_v7  ;;  %v337_v30 = vadd.f32 %v335_v25, %v326_v23  ;;  %v338_v31 = vadd.f32 %v336_v26, %v327_v24  ;;  %v346_v32 = vmul.f32 %v968_v21, %v345_v28  ;;  %v347_v33 = vmul.f32 %v969_v22, %v345_v28  ;;  %v1130_v7 = vld [vmem:[%s1540_s4 + $0x28] sm:$0xff]   ;;  %v762_v11 = vld [vmem:[%s312_s30] sm:$0xff]  ;;  %s805_s12 = sshll.u32 %s298_s11, 4  ;;  %s1487_s18 = scalar_lea.hbm %s1542_s6, %s957_s13  ;;  %s1482_s12 = int_to_ptr.vmem [resolvable:$true] %s805_s12 }
  0x39   : > { %vm764_vm1 = vcmp.gt.f32.partialorder %v762_v11, 0.0  ;;  %vm765_vm2 = vcmp.gt.f32.partialorder %v763_v12, 0.0  ;;  %vm690_vm3 = vcmask 130048   ;;  %s1490_s24 = scalar_lea.sflag [#allocation5], %s296_s8  ;;  %s1148_s20 = scalar_lea.vmem %s1482_s12, 256 }
  0x3a   : > { %v348_v36 = vadd.f32 %v346_v32, %v337_v30  ;;  %v349_v37 = vadd.f32 %v347_v33, %v338_v31  ;;  %v768_v14 = vsel %vm765_vm2, 1, %v1233_v2  ;;  %p1149_p10 = scmp.ne.s32.totalorder %s1482_s12, %s1148_s20  ;;  %s1236_s15 = smov [#allocation7]  }
  0x3b   : > { %466 = vmatpush1.bf16.msra.mxu0 %v1112_v8  ;;  %v1131_v8 = vld [vmem:[%s1540_s4 + $0x30] sm:$0xff]   ;;  %s1152_s27 = sshll.u32 %s1236_s15, 4  ;;  %s1153_s27 = int_to_ptr.vmem [resolvable:$false] %s1152_s27 }
  0x3c   : > { %467 = vmatprep.subr.bf16.mxu0 %v1113_v9  ;;  %v350_v39 = vpack.c.bf16 %v349_v37, %v348_v36  ;;  %v1132_v9 = vld [vmem:[%s1540_s4 + $0x38] sm:$0xff]   ;;  %p1150_p11 = pnand %p1149_p10, %p1314_p4  ;;  %s1154_s0 = scalar_lea.vmem %s1153_s27, 512 }
  0x3d   : > { %p1155_p0 = scmp.lt.s32.totalorder %s1482_s12, %s1153_s27  ;;  %p1156_p1 = scmp.lt.s32.totalorder %s1154_s0, %s1148_s20 }
  0x3e   : > { %p1151_p13 = pneg %p1150_p11 }
  0x3f   : > { %468 = vmatpush1.bf16.msra.mxu0 %v1115_v13  ;;  %v767_v13 = vsel %vm764_vm1, 1, %v1233_v2  ;;  %p1157_p2 = por %p1156_p1, %p1155_p0 }
  0x40   : > { %469 = vmatprep.subr.bf16.mxu0 %v1116_v15  ;;  %770 = vperm.xlu0 %1100, %v767_v13  }
  0x41   : > { %p1158_p3 = pnand %p1157_p2, %p1151_p13 }
  0x43   : > { %470 = vmatpush1.bf16.msra.mxu0 %v1118_v27 }
  0x44   : > { %471 = vmatprep.subr.bf16.mxu0 %v1119_v29  ;;  %773 = vperm.xlu0 %1100, %v768_v14  }
  0x47   : > { %472 = vmatpush1.bf16.msra.mxu0 %v1121_v34 }
  0x48   : > { %473 = vmatprep.subr.bf16.mxu0 %v1122_v35 }
  0x4b   : > { %474 = vmatpush1.bf16.msra.mxu0 %v1124_v38 }
  0x4e   : > { %492 = vmatmul.mubr.bf16.vlgmr.msra.gmra.mrb[0].mxu0 %v350_v39 }
 0x121   : > { %v493_v48 = vpop.f32.mrb[0].mxu0 }
 0x122   : > { %v494_v49 = vadd.f32 %v493_v48, %v372_v46  ;;  %v495_v50 = vpop.f32.mrb[1].mxu0  ;;  %v771_v48 = vpop.permute.xlu0 %770 }
 0x123   : > { %v496_v51 = vadd.f32 %v495_v50, %v376_v47  ;;  %v497_v52 = vpop.f32.mrb[2].mxu0  ;;  %v756_v50 = vadd.s32 8, %v1422_v42  ;;  %vm775_vm4 = vcmp.eq.s32.totalorder %v771_v48, 1 }
 0x124   : > { %v502_v53 = vmul.f32 0.01, %v494_v49  ;;  %v498_v54 = vadd.f32 %v497_v52, %v372_v46  ;;  %v499_v55 = vpop.f32.mrb[3].mxu0 }
 0x125   : > { %v503_v56 = vmul.f32 0.01, %v496_v51  ;;  %v500_v57 = vadd.f32 %v499_v55, %v376_v47 }
 0x126   : > { %v504_v58 = vmul.f32 0.01, %v498_v54  ;;  %v506_v60 = vmax.f32 %v494_v49, %v502_v53  ;;  %v761_v49 = vand.u32 127, %v369_v41 }
 0x127   : > { %v505_v59 = vmul.f32 0.01, %v500_v57  ;;  %v507_v62 = vmax.f32 %v496_v51, %v503_v56  ;;  %v774_v51 = vpop.permute.xlu0 %773 }
 0x128   : > { %v508_v61 = vmax.f32 %v498_v54, %v504_v58  ;;  %vm779_vm5 = vcmp.ge.s32.totalorder %v761_v49, %v1422_v42  ;;  %vm766_vm6 = vcmp.eq.s32.totalorder %v761_v49, 0  ;;  %vm780_vm7 = vcmp.ge.s32.totalorder %v761_v49, %v756_v50 }
 0x129   : > { %v509_v63 = vmax.f32 %v500_v57, %v505_v59  ;;  %vm776_vm8 = vcmp.eq.s32.totalorder %v774_v51, 1  ;;  %vm781_vm9 = vmor %vm775_vm4, %vm779_vm5 }
 0x12a   : > { %v510_v0 = vpack.c.bf16 %v508_v61, %v506_v60  ;;  %vm777_vm10 = vmand %vm775_vm4, %vm766_vm6 }
 0x12b   : > { %v1429_v1 = vpack.c.bf16 %v509_v63, %v507_v62  ;;  %vm782_vm11 = vmor %vm776_vm8, %vm780_vm7 }
 0x12c   : > { %990 = vmatprep.subr.bf16.mxu1 %v510_v0  ;;  %vm778_vm12 = vmand %vm776_vm8, %vm766_vm6 }
 0x12d   : > { %991 = vmatpush3.bf16.xpose.msra.mxu1 %v510_v0 }
 0x12e   : > { %1008 = vmatprep.subr.bf16.mxu1 %v1234_v10 }
 0x134   : > { %993 = vmatmul.mubr.bf16.vlgmr.msra.gmra.mrb[0].mxu1 %v1126_v3 }
 0x135   : > { %996 = vmatprep.mubr.bf16.mxu1 %v1127_v4 }
 0x13c   : > { %997 = vmatmul.mubr.bf16.gmra.mrb[4].mxu1 %v1128_v5 }
 0x13d   : > { %1000 = vmatprep.mubr.bf16.mxu1 %v1129_v6 }
 0x144   : > { %1001 = vmatmul.mubr.bf16.gmra.mrb[8].mxu1 %v1130_v7 }
 0x145   : > { %1004 = vmatprep.mubr.bf16.mxu1 %v1131_v8 }
 0x14c   : > { %1005 = vmatmul.mubr.bf16.gmra.mrb[12].mxu1 %v1132_v9 }
 0x14d   : > { %1024 = vmatprep.mubr.msk.bf16.mxu1 %vm1235_vm0, %v1234_v10 }
 0x207   : > { %v994_v15 = vpop.f32.mrb[0].mxu1 }
 0x208   : > { %v611_v16 = vpop.f32.mrb[1].mxu1 }
 0x209   : > { %v995_v17 = vpop.f32.mrb[2].mxu1 }
 0x20a   : > { %v683_v18 = vpack.c.bf16 %v995_v17, %v994_v15  ;;  %v614_v19 = vpop.f32.mrb[3].mxu1 }
 0x20b   : > { %v682_v20 = vpack.c.bf16 %v614_v19, %v611_v16 }
 0x20c   : > { %692 = vst.msk [vmem:[#allocation3 + $0x8] sm:$0xff] %vm690_vm3, %v683_v18 }
 0x20d   : > { %691 = vst.msk [vmem:[#allocation3] sm:$0xff] %vm690_vm3, %v682_v20 }
 0x20f   : > { %v998_v21 = vpop.f32.mrb[4].mxu1 }
 0x210   : > { %v627_v22 = vpop.f32.mrb[5].mxu1 }
 0x211   : > { %v999_v23 = vpop.f32.mrb[6].mxu1 }
 0x212   : > { %v685_v24 = vpack.c.bf16 %v999_v23, %v998_v21  ;;  %v630_v25 = vpop.f32.mrb[7].mxu1 }
 0x213   : > { %v684_v26 = vpack.c.bf16 %v630_v25, %v627_v22  ;;  %v706_v29 = vld [vmem:[#allocation3 + $0x8] sm:$0xff] }
 0x214   : > { %694 = vst.msk [vmem:[#allocation3 + $0x18] sm:$0xff] %vm690_vm3, %v685_v24  ;;  %v705_v2 = vld [vmem:[#allocation3] sm:$0xff] }
 0x215   : > { %693 = vst.msk [vmem:[#allocation3 + $0x10] sm:$0xff] %vm690_vm3, %v684_v26  ;;  %1009 = vmatpush3.bf16.msra.mxu1 %v705_v2 }
 0x216   : > { %1010 = vmatprep.subr.bf16.mxu1 %v1234_v10 }
 0x217   : > { %v1002_v27 = vpop.f32.mrb[8].mxu1 }
 0x218   : > { %v643_v28 = vpop.f32.mrb[9].mxu1 }
 0x219   : > { %v1003_v30 = vpop.f32.mrb[10].mxu1  ;;  %1011 = vmatpush3.bf16.msra.mxu1 %v706_v29 }
 0x21a   : > { %v687_v31 = vpack.c.bf16 %v1003_v30, %v1002_v27  ;;  %v646_v32 = vpop.f32.mrb[11].mxu1  ;;  %1012 = vmatprep.subr.bf16.mxu1 %v1234_v10 }
 0x21b   : > { %v686_v33 = vpack.c.bf16 %v646_v32, %v643_v28  ;;  %v708_v37 = vld [vmem:[#allocation3 + $0x18] sm:$0xff] }
 0x21c   : > { %696 = vst.msk [vmem:[#allocation3 + $0x28] sm:$0xff] %vm690_vm3, %v687_v31  ;;  %v707_v34 = vld [vmem:[#allocation3 + $0x10] sm:$0xff] }
 0x21d   : > { %695 = vst.msk [vmem:[#allocation3 + $0x20] sm:$0xff] %vm690_vm3, %v686_v33  ;;  %1013 = vmatpush3.bf16.msra.mxu1 %v707_v34 }
 0x21e   : > { %1014 = vmatprep.subr.bf16.mxu1 %v1234_v10 }
 0x21f   : > { %v1006_v35 = vpop.f32.mrb[12].mxu1 }
 0x220   : > { %v659_v36 = vpop.f32.mrb[13].mxu1 }
 0x221   : > { %v1007_v38 = vpop.f32.mrb[14].mxu1  ;;  %1015 = vmatpush3.bf16.msra.mxu1 %v708_v37 }
 0x222   : > { %v689_v39 = vpack.c.bf16 %v1007_v38, %v1006_v35  ;;  %v662_v40 = vpop.f32.mrb[15].mxu1  ;;  %1016 = vmatprep.subr.bf16.mxu1 %v1234_v10 }
 0x223   : > { %v688_v43 = vpack.c.bf16 %v662_v40, %v659_v36  ;;  %v710_v45 = vld [vmem:[#allocation3 + $0x28] sm:$0xff] }
 0x224   : > { %698 = vst.msk [vmem:[#allocation3 + $0x38] sm:$0xff] %vm690_vm3, %v689_v39  ;;  %v709_v44 = vld [vmem:[#allocation3 + $0x20] sm:$0xff] }
 0x225   : > { %697 = vst.msk [vmem:[#allocation3 + $0x30] sm:$0xff] %vm690_vm3, %v688_v43  ;;  %1017 = vmatpush3.bf16.msra.mxu1 %v709_v44 }
 0x226   : > { %1018 = vmatprep.subr.bf16.mxu1 %v1234_v10 }
 0x229   : > { %1019 = vmatpush3.bf16.msra.mxu1 %v710_v45 }
 0x22a   : > { %1020 = vmatprep.subr.bf16.mxu1 %v1234_v10 }
 0x22b   : > { %v712_v47 = vld [vmem:[#allocation3 + $0x38] sm:$0xff] }
 0x22c   : > { %v711_v46 = vld [vmem:[#allocation3 + $0x30] sm:$0xff] }
 0x22d   : > { %1021 = vmatpush3.bf16.msra.mxu1 %v711_v46 }
 0x22e   : > { %1022 = vmatprep.subr.bf16.mxu1 %v1234_v10 }
 0x231   : > { %1023 = vmatpush3.bf16.msra.mxu1 %v712_v47 }
 0x234   : > { %1025 = vmatmul.mubr.bf16.vlgmr.msra.gmra.mrb[16].mxu1 %v1429_v1 }
 0x307   : > { %v747_v52 = vpop.f32.mrb[16].mxu1 }
 0x308   : > { %v783_v53 = vsel %vm781_vm9, -inf, %v747_v52  ;;  %v1026_v41 = vpop.f32.mrb[17].mxu1 }
 0x309   : > { %v785_v54 = vsel %vm777_vm10, 0.0, %v783_v53  ;;  %v750_v42 = vpop.f32.mrb[18].mxu1 }
 0x30a   : > { %787 = vst [vmem:[%s298_s11] sm:$0xff] %v785_v54  ;;  %v784_v55 = vsel %vm782_vm11, -inf, %v750_v42  ;;  %v1027_v56 = vpop.f32.mrb[19].mxu1 }
 0x30b   : > { %v786_v57 = vsel %vm778_vm12, 0.0, %v784_v55 }
 0x30c   : > { %788 = vst [vmem:[%s298_s11 + $0x8] sm:$0xff] %v786_v57 }
 0x30d   : > { %1161 = shalt.err (!%p1158_p3)
}
 0x30e   : > { %s1162_s16 = scalar_lea.hbm %s1487_s18, 256  ;;  %s1166_s8 = scalar_lea.hbm %s1542_s6, 512 }
 0x30f   : > { %p1163_p5 = scmp.ne.s32.totalorder %s1487_s18, %s1162_s16  ;;  %p1167_p9 = scmp.lt.u32.totalorder %s1487_s18, %s1542_s6 }
 0x310   : > { %p1168_p12 = scmp.lt.u32.totalorder %s1166_s8, %s1162_s16  ;;  %p1170_p11 = scmp.lt.u32.totalorder %s1162_s16, %s1487_s18 }
 0x311   : > { %p1164_p6 = pnand %p1163_p5, %p1314_p4 }
 0x312   : > { %p1169_p10 = por %p1168_p12, %p1167_p9 }
 0x313   : > { %p1165_p7 = pneg %p1164_p6 }
 0x314   : > { %p1171_p13 = por %p1170_p11, %p1169_p10 }
 0x316   : > { %p1172_p0 = pnand %p1171_p13, %p1165_p7 }
 0x318   : > { %1175 = shalt.err (!%p1172_p0)
}
 0x319   : > { %s1237_s13 = smov 128   ;;  %s1238_s14 = smov 8  }
 0x31a   : > { %1033 = dma.vmem_to_hbm [thread:$0]  (%p1314_p4), %s1482_s12, 256, %s1487_s18, %s1490_s24, %s1237_s13, %s1237_s13, %s1238_s14  }
 0x31b PF: > { %p1045_p1 = scmp.ge.s32.totalorder %s1230_s26, 2  ;;  %s820_s17 = sand.u32 1, %s1210_s21  }
 0x31c   : > { %s821_s20 = scalar_lea.sflag [#allocation5], %s820_s17 }
 0x31d   : > { %p1040_p2 = pnand %p1045_p1, %p1321_p8 }
 0x31f   : > { %1205 = dma.done.wait (!%p1040_p2), %s821_s20, 256  }
 0x320   : > { %1207 = vsyncadd (!%p1040_p2), %s821_s20, 4294967040  ;;  %s20_s26 = sadd.s32 1, %s1230_s26   ;;  %s1549_s21 = smov %s1214_s22 }
 0x321   : > { %p17_p3 = scmp.ge.s32.totalorder %s20_s26, 4   ;;  %s1550_s22 = smov %s1218_s23 }
 0x322   : > { %s1551_s23 = smov %s1327_s10  ;;  %s1552_s24 = smov %s1226_s25 }
 0x323   : > { %s1553_s25 = smov %s1555_s29  ;;  %19 = sbr.rel (!%p17_p3) target bundleno = 7 (0x7), region = 94 }
 0x32a   :  { %826 = vsyncpa [#allocation5], 1 }
 0x32b   :  { %828 = vsyncpa [#allocation5 + $0x1], 1 }
 0x32c   :  { %829 = vsyncpa [#allocation6], 1 }
 0x32d   :  { %831 = vsyncpa [#allocation6 + $0x1], 1 }

</bundles_post_ra>
